<compile_context>
chip_gen: v7x
topology: tpu7x:2x2x1
jax: 0.10.0
libtpu: 0.0.40
codegen_flags: <defaults>
</compile_context>

<pallas_src>
import functools
import math

import jax
import jax.numpy as jnp
from jax.experimental import pallas as pl
from jax.experimental.pallas import tpu as pltpu


def _round_hidden(n_embd: int, expand: int = 4) -> int:
    hidden_dim = expand * n_embd
    n_hidden = int(2 * hidden_dim / 3)
    N = 256
    return (n_hidden - 1) // N * N + N


# ---------------------------------------------------------------------------
# Generation detection & tile selection
# ---------------------------------------------------------------------------

def _device_kind() -> str:
    try:
        return jax.devices()[0].device_kind.lower()
    except Exception:
        return ""


def _physical_vmem_bytes(kind: str) -> int:
    try:
        return int(pltpu.get_tpu_info().vmem_capacity_bytes)
    except Exception:
        pass
    # v7x has 64 MiB per TensorCore; v5e/v6e have 128 MiB.
    return (64 if "v7" in kind else 128) * 1024 * 1024


def _default_tm(kind: str) -> int:
    # Weights are re-streamed once per M tile, so arithmetic intensity is
    # ~tm flops per weight byte.  Ridge points: v5e ~240, v7x ~320/TC, v6e ~680.
    if "v5" in kind:
        return 256
    return 512              # v6e / v7x / unknown


def _gate_in_bf16(kind: str) -> bool:
    # bf16 VPU/EUP exists on v6e/v7x only.
    return ("v6" in kind) or ("v7" in kind)


def _select_tiles(M, D, H, tm_req, th_req, x_bytes, out_bytes, use_acc,
                  vmem_limit, kind):
    # --- token tile: as large as possible (weight reuse), but don't pad far
    # past the real token count, and keep >=2 M tiles on v7x (2 TC/chip). ---
    tm = _default_tm(kind) if tm_req is None else tm_req
    m_pad128 = pl.cdiv(max(M, 1), 128) * 128
    tm = max(128, min(tm, m_pad128))
    tm = (tm // 128) * 128
    if "v7" in kind:
        while tm > 128 and pl.cdiv(M, tm) < 2:
            tm = max(128, (tm // 2) // 128 * 128)

    budget = int(vmem_limit * 0.75)          # headroom for Mosaic internal scratch

    def vmem_use(tm_, th_):
        w = 2 * 3 * D * th_ * 2              # double-buffered bf16 weight blocks
        xb = 2 * tm_ * D * x_bytes           # double-buffered x blocks
        ob = 2 * tm_ * D * out_bytes         # double-buffered out blocks
        ab = tm_ * D * 4 if use_acc else 0   # resident f32 accumulator
        gt = 3 * tm_ * th_ * 4               # h1/h2/gate temporaries (worst case)
        return w + xb + ob + ab + gt

    if th_req is not None:
        th = th_req
    else:
        # Prefer th = H: weight block indices become constant over the grid so
        # each weight is fetched from HBM exactly once.  Otherwise the largest
        # 256-multiple divisor of H that fits (v6e/v7x MXU is 2x256x256;
        # 128-wide tiles half-fill it).
        candidates = [H] + [c for c in (2048, 1024, 512, 256) if c < H and H % c == 0]
        th = candidates[-1]
        for c in candidates:
            if vmem_use(tm, c) <= budget:
                th = c
                break
        # If even the smallest th is over budget, shed tm (never below 128).
        while tm > 128 and vmem_use(tm, th) > budget:
            tm -= 128

    return tm, th


# ---------------------------------------------------------------------------
# Kernels
# ---------------------------------------------------------------------------

def _swiglu_gate(h1, h2, gate_bf16):
    """SwiGLU gate from the two f32 MXU results; returns bf16 for the 3rd matmul."""
    if gate_bf16:                      # bf16 VPU/EUP available (v6e / v7x)
        h1 = h1.astype(jnp.bfloat16)
        h2 = h2.astype(jnp.bfloat16)
        return (h1 * jax.nn.sigmoid(h1)) * h2
    # v5e: no bf16 VPU/EUP -> compute the gate in f32, cast once at the end.
    return ((h1 * jax.nn.sigmoid(h1)) * h2).astype(jnp.bfloat16)


def _mlp_kernel_acc(gate_bf16, x_ref, w1_ref, w2_ref, w3_ref, o_ref, acc_ref):
    """Non-f32 output: accumulate into a resident f32 scratch, cast only on the
    last reduction step."""
    h = pl.program_id(1)

    @pl.when(h == 0)
    def _init():
        acc_ref[...] = jnp.zeros_like(acc_ref)

    x = x_ref[...].astype(jnp.bfloat16)      # on-chip cast; block resident across h
    h1 = jnp.dot(x, w1_ref[...], preferred_element_type=jnp.float32)
    h2 = jnp.dot(x, w2_ref[...], preferred_element_type=jnp.float32)
    g = _swiglu_gate(h1, h2, gate_bf16)
    acc_ref[...] += jnp.dot(g, w3_ref[...], preferred_element_type=jnp.float32)

    @pl.when(h == pl.num_programs(1) - 1)
    def _store():
        o_ref[...] = acc_ref[...].astype(o_ref.dtype)


def _mlp_kernel_f32out(gate_bf16, x_ref, w1_ref, w2_ref, w3_ref, o_ref):
    """f32 output: accumulate directly into the resident output block (no
    accumulator scratch, no final copy)."""
    h = pl.program_id(1)

    @pl.when(h == 0)
    def _init():
        o_ref[...] = jnp.zeros_like(o_ref)

    x = x_ref[...].astype(jnp.bfloat16)
    h1 = jnp.dot(x, w1_ref[...], preferred_element_type=jnp.float32)
    h2 = jnp.dot(x, w2_ref[...], preferred_element_type=jnp.float32)
    g = _swiglu_gate(h1, h2, gate_bf16)
    o_ref[...] += jnp.dot(g, w3_ref[...], preferred_element_type=jnp.float32)


# ---------------------------------------------------------------------------
# Wrapper
# ---------------------------------------------------------------------------

def mlp_forward(x, w1t, w2t, w3t, *, tm=None, th=None, out_dtype=None):
    """SwiGLU MLP forward: (silu(x @ w1t) * (x @ w2t)) @ w3t.

    x:   (..., n_embd), any float dtype (cast to bf16 on-chip).
    w1t: (n_embd, n_hidden)  c_fc1.weight.T   (pre-transpose ONCE at init,
    w2t: (n_embd, n_hidden)  c_fc2.weight.T    ideally stored in bf16).
    w3t: (n_hidden, n_embd)  c_proj.weight.T
    tm, th:    token / hidden tile sizes (multiples of 128); auto-selected per
               TPU generation when None.
    out_dtype: output dtype; default x.dtype.  Pass jnp.bfloat16 in bf16 models
               to halve output HBM writeback and out-buffer VMEM.
    """
    orig_shape = x.shape
    D = orig_shape[-1]
    M = int(math.prod(orig_shape[:-1]))
    H = w1t.shape[1]
    assert w1t.shape == (D, H) and w2t.shape == (D, H) and w3t.shape == (H, D)

    out_dtype = jnp.dtype(x.dtype if out_dtype is None else out_dtype)
    use_acc = out_dtype != jnp.float32       # f32 output accumulates in-place

    kind = _device_kind()
    vmem_limit = _physical_vmem_bytes(kind) * 8 // 10      # ~80% of physical
    gate_bf16 = _gate_in_bf16(kind)

    tm, th = _select_tiles(M, D, H, tm, th,
                           x_bytes=jnp.dtype(x.dtype).itemsize,
                           out_bytes=out_dtype.itemsize,
                           use_acc=use_acc, vmem_limit=vmem_limit, kind=kind)
    assert tm % 128 == 0, "tm must be a multiple of 128"
    assert th % 128 == 0, "th must be a multiple of 128 (256-multiples on v6e/v7x)"
    assert H % th == 0, "n_hidden must be a multiple of th"

    M_pad = pl.cdiv(max(M, 1), tm) * tm
    x2d = x.reshape(M, D)
    if M_pad != M:
        x2d = jnp.pad(x2d, ((0, M_pad - M), (0, 0)))

    # MXU operands are bf16; no-op if the caller already stores bf16 weights.
    w1b = w1t if w1t.dtype == jnp.bfloat16 else w1t.astype(jnp.bfloat16)
    w2b = w2t if w2t.dtype == jnp.bfloat16 else w2t.astype(jnp.bfloat16)
    w3b = w3t if w3t.dtype == jnp.bfloat16 else w3t.astype(jnp.bfloat16)

    grid = (M_pad // tm, H // th)

    # Weights are fetched once if their block index is constant (th == H),
    # otherwise re-streamed once per M tile.
    weight_bytes = 3 * D * H * 2 * (1 if th == H else grid[0])
    cost = pl.CostEstimate(
        flops=6 * M_pad * D * H,
        transcendentals=M_pad * H,
        bytes_accessed=(M_pad * D * x2d.dtype.itemsize
                        + M_pad * D * out_dtype.itemsize
                        + weight_bytes),
    )

    if use_acc:
        kernel = functools.partial(_mlp_kernel_acc, gate_bf16)
        scratch_shapes = [pltpu.VMEM((tm, D), jnp.float32)]
    else:
        kernel = functools.partial(_mlp_kernel_f32out, gate_bf16)
        scratch_shapes = []

    out2d = pl.pallas_call(
        kernel,
        out_shape=jax.ShapeDtypeStruct((M_pad, D), out_dtype),
        grid_spec=pltpu.PrefetchScalarGridSpec(
            num_scalar_prefetch=0,
            grid=grid,
            in_specs=[
                pl.BlockSpec((tm, D), lambda i, h: (i, 0)),   # x tile (resident over h)
                pl.BlockSpec((D, th), lambda i, h: (0, h)),   # W1 (in,out) H-tile
                pl.BlockSpec((D, th), lambda i, h: (0, h)),   # W2 (in,out) H-tile
                pl.BlockSpec((th, D), lambda i, h: (h, 0)),   # W3 (in,out) H-tile
            ],
            out_specs=pl.BlockSpec((tm, D), lambda i, h: (i, 0)),
            scratch_shapes=scratch_shapes,
        ),
        compiler_params=pltpu.CompilerParams(
            dimension_semantics=("parallel", "arbitrary"),
            vmem_limit_bytes=int(vmem_limit),
        ),
        cost_estimate=cost,
    )(x2d, w1b, w2b, w3b)

    return out2d[:M].reshape(orig_shape[:-1] + (D,))


# ---------------------------------------------------------------------------
# References & test
# ---------------------------------------------------------------------------

def _ref_module(x, w_fc1, w_fc2, w_proj):
    """Pure f32 reference with the PyTorch module's semantics."""
    h = jax.nn.silu(x @ w_fc1.T) * (x @ w_fc2.T)
    return h @ w_proj.T


def _ref_kernel_numerics(x, w1t, w2t, w3t, gate_bf16, out_dtype):
    """Pure-JAX reference mirroring the kernel's mixed-precision path."""
    xb = x.astype(jnp.bfloat16)
    h1 = jnp.dot(xb, w1t.astype(jnp.bfloat16), preferred_element_type=jnp.float32)
    h2 = jnp.dot(xb, w2t.astype(jnp.bfloat16), preferred_element_type=jnp.float32)
    if gate_bf16:
        h1 = h1.astype(jnp.bfloat16)
        h2 = h2.astype(jnp.bfloat16)
        g = (h1 * jax.nn.sigmoid(h1)) * h2
    else:
        g = ((h1 * jax.nn.sigmoid(h1)) * h2).astype(jnp.bfloat16)
    out = jnp.dot(g, w3t.astype(jnp.bfloat16), preferred_element_type=jnp.float32)
    return out.astype(out_dtype)


if __name__ == "__main__":
    n_embd = 128
    n_hidden = _round_hidden(n_embd, expand=4)   # -> 512

    key = jax.random.PRNGKey(0)
    kx, k1, k2, k3, kx2 = jax.random.split(key, 5)

    # nn.Linear weights are (out_features, in_features); pre-transpose ONCE to
    # (in, out) layout and store bf16 at init (what the kernel feeds the MXU).
    s1 = 1.0 / math.sqrt(n_embd)
    s3 = 1.0 / math.sqrt(n_hidden)
    w_fc1 = jax.random.uniform(k1, (n_hidden, n_embd), jnp.float32, -s1, s1)
    w_fc2 = jax.random.uniform(k2, (n_hidden, n_embd), jnp.float32, -s1, s1)
    w_proj = jax.random.uniform(k3, (n_embd, n_hidden), jnp.float32, -s3, s3)
    w1t = w_fc1.T.astype(jnp.bfloat16)
    w2t = w_fc2.T.astype(jnp.bfloat16)
    w3t = w_proj.T.astype(jnp.bfloat16)

    gate_bf16 = _gate_in_bf16(_device_kind())

    mlp_f32 = jax.jit(mlp_forward)                                      # f32 out
    mlp_bf16 = jax.jit(functools.partial(mlp_forward, out_dtype=jnp.bfloat16))

    ok = True

    # Case 1: tiny decode-like batch (B=2, T=8), f32 output path
    # (direct accumulation into the output block, no extra scratch).
    x = jax.random.normal(kx, (2, 8, n_embd), dtype=jnp.float32)
    out = jax.block_until_ready(mlp_f32(x, w1t, w2t, w3t))
    ref_k = _ref_kernel_numerics(x, w1t, w2t, w3t, gate_bf16, jnp.float32)
    ref_m = _ref_module(x, w_fc1, w_fc2, w_proj)
    ok &= out.shape == x.shape and out.dtype == x.dtype
    ok &= bool(jnp.allclose(out, ref_k, atol=2e-2, rtol=2e-2))   # kernel numerics
    ok &= bool(jnp.allclose(out, ref_m, atol=6e-2, rtol=6e-2))   # module semantics

    # Case 2: larger prefill-like batch (B=2, T=256), bf16 output path
    # (resident f32 accumulator, bf16 final store -> half output HBM traffic).
    x2 = jax.random.normal(kx2, (2, 256, n_embd), dtype=jnp.float32)
    out2 = jax.block_until_ready(mlp_bf16(x2, w1t, w2t, w3t))
    ref2 = _ref_kernel_numerics(x2, w1t, w2t, w3t, gate_bf16, jnp.bfloat16)
    ok &= out2.shape == x2.shape and out2.dtype == jnp.bfloat16
    ok &= bool(jnp.allclose(out2.astype(jnp.float32), ref2.astype(jnp.float32),
                            atol=2e-2, rtol=2e-2))

    print("KERNEL_OK" if ok else "KERNEL_MISMATCH")
</pallas_src>

<mosaic_0001>
module attributes {stable_mosaic.version = 11 : i64} {
  func.func @_mlp_kernel_f32out(%arg0: i32, %arg1: i32, %arg2: memref<128x128xf32, #tpu.memory_space<vmem>>, %arg3: memref<128x512xbf16, #tpu.memory_space<vmem>>, %arg4: memref<128x512xbf16, #tpu.memory_space<vmem>>, %arg5: memref<512x128xbf16, #tpu.memory_space<vmem>>, %arg6: memref<128x128xf32, #tpu.memory_space<vmem>>) attributes {dimension_semantics = [#tpu.dimension_semantics<parallel>, #tpu.dimension_semantics<arbitrary>], iteration_bounds = array<i64: 1, 1>, scalar_prefetch = 0 : i64, scratch_operands = 0 : i64, tpu.core_type = #tpu.core_type<tc>, window_params = [{transform_indices = @transform_0, window_bounds = array<i64: 128, 128>}, {transform_indices = @transform_1, window_bounds = array<i64: 128, 512>}, {transform_indices = @transform_2, window_bounds = array<i64: 128, 512>}, {transform_indices = @transform_3, window_bounds = array<i64: 512, 128>}, {transform_indices = @transform_4, window_bounds = array<i64: 128, 128>}]} {
    %c0_i32 = arith.constant 0 : i32
    %0 = arith.cmpi eq, %arg1, %c0_i32 : i32
    %1 = arith.extui %0 : i1 to i32
    %c0_i32_0 = arith.constant 0 : i32
    %2 = arith.cmpi ne, %1, %c0_i32_0 : i32
    scf.if %2 {
      %cst_15 = arith.constant 0.000000e+00 : f32
      %22 = vector.broadcast %cst_15 : f32 to vector<128x128xf32>
      %c0_16 = arith.constant 0 : index
      %c0_17 = arith.constant 0 : index
      %23 = vector.load %arg6[%c0_16, %c0_17] : memref<128x128xf32, #tpu.memory_space<vmem>>, vector<128x128xf32>
      tpu.vector_store %arg6[%c0_16, %c0_17], %22 {strides = array<i32>} : memref<128x128xf32, #tpu.memory_space<vmem>>, vector<128x128xf32>,
    } else {
    }
    %c0 = arith.constant 0 : index
    %c0_1 = arith.constant 0 : index
    %3 = vector.load %arg2[%c0, %c0_1] : memref<128x128xf32, #tpu.memory_space<vmem>>, vector<128x128xf32>
    %4 = arith.truncf %3 : vector<128x128xf32> to vector<128x128xbf16>
    %c0_2 = arith.constant 0 : index
    %c0_3 = arith.constant 0 : index
    %5 = vector.load %arg3[%c0_2, %c0_3] : memref<128x512xbf16, #tpu.memory_space<vmem>>, vector<128x512xbf16>
    %cst = arith.constant dense<0.000000e+00> : vector<128x512xf32>
    %6 = tpu.matmul %4, %5, %cst {dimension_numbers = #tpu.dot_dimension_numbers<[1], [0], [0], [1], [0, 0, 1, 1], [], []>} : vector<128x128xbf16>, vector<128x512xbf16>, vector<128x512xf32> -> vector<128x512xf32>
    %c0_4 = arith.constant 0 : index
    %c0_5 = arith.constant 0 : index
    %7 = vector.load %arg4[%c0_4, %c0_5] : memref<128x512xbf16, #tpu.memory_space<vmem>>, vector<128x512xbf16>
    %cst_6 = arith.constant dense<0.000000e+00> : vector<128x512xf32>
    %8 = tpu.matmul %4, %7, %cst_6 {dimension_numbers = #tpu.dot_dimension_numbers<[1], [0], [0], [1], [0, 0, 1, 1], [], []>} : vector<128x128xbf16>, vector<128x512xbf16>, vector<128x512xf32> -> vector<128x512xf32>
    %9 = arith.negf %6 : vector<128x512xf32>
    %10 = math.exp %9 : vector<128x512xf32>
    %cst_7 = arith.constant 1.000000e+00 : f32
    %11 = vector.broadcast %cst_7 : f32 to vector<128x512xf32>
    %12 = arith.addf %11, %10 : vector<128x512xf32>
    %13 = arith.divf %11, %12 : vector<128x512xf32>
    %14 = arith.mulf %6, %13 : vector<128x512xf32>
    %15 = arith.mulf %14, %8 : vector<128x512xf32>
    %16 = arith.truncf %15 : vector<128x512xf32> to vector<128x512xbf16>
    %c0_8 = arith.constant 0 : index
    %c0_9 = arith.constant 0 : index
    %17 = vector.load %arg6[%c0_8, %c0_9] : memref<128x128xf32, #tpu.memory_space<vmem>>, vector<128x128xf32>
    %c0_10 = arith.constant 0 : index
    %c0_11 = arith.constant 0 : index
    %18 = vector.load %arg5[%c0_10, %c0_11] : memref<512x128xbf16, #tpu.memory_space<vmem>>, vector<512x128xbf16>
    %cst_12 = arith.constant dense<0.000000e+00> : vector<128x128xf32>
    %19 = tpu.matmul %16, %18, %cst_12 {dimension_numbers = #tpu.dot_dimension_numbers<[1], [0], [0], [1], [0, 0, 1, 1], [], []>} : vector<128x512xbf16>, vector<512x128xbf16>, vector<128x128xf32> -> vector<128x128xf32>
    %20 = arith.addf %17, %19 : vector<128x128xf32>
    %c0_13 = arith.constant 0 : index
    %c0_14 = arith.constant 0 : index
    %21 = vector.load %arg6[%c0_13, %c0_14] : memref<128x128xf32, #tpu.memory_space<vmem>>, vector<128x128xf32>
    tpu.vector_store %arg6[%c0_13, %c0_14], %20 {strides = array<i32>} : memref<128x128xf32, #tpu.memory_space<vmem>>, vector<128x128xf32>,
    return
  }
  func.func @transform_0(%arg0: i32, %arg1: i32) -> (i32, i32) {
    %c0_i32 = arith.constant 0 : i32
    %c0_i32_0 = arith.constant 0 : i32
    return %arg0, %c0_i32 : i32, i32
  }
  func.func @transform_1(%arg0: i32, %arg1: i32) -> (i32, i32) {
    %c0_i32 = arith.constant 0 : i32
    %c0_i32_0 = arith.constant 0 : i32
    return %c0_i32, %arg1 : i32, i32
  }
  func.func @transform_2(%arg0: i32, %arg1: i32) -> (i32, i32) {
    %c0_i32 = arith.constant 0 : i32
    %c0_i32_0 = arith.constant 0 : i32
    return %c0_i32, %arg1 : i32, i32
  }
  func.func @transform_3(%arg0: i32, %arg1: i32) -> (i32, i32) {
    %c0_i32 = arith.constant 0 : i32
    %c0_i32_0 = arith.constant 0 : i32
    return %arg1, %c0_i32 : i32, i32
  }
  func.func @transform_4(%arg0: i32, %arg1: i32) -> (i32, i32) {
    %c0_i32 = arith.constant 0 : i32
    %c0_i32_0 = arith.constant 0 : i32
    return %arg0, %c0_i32 : i32, i32
  }
}

</mosaic_0001>

<bundles_post_ra>
// kernel: mlp_forward.1
= control target key start
LH: loop header
LB: loop body
LE: loop exit
PB: predicated region body
PF: predicated region fallthrough
CT: control target
= control target key end

     0   :  { %9 = vsyncpa [#allocation3], 0  ;;  %s3444_s0 = inlined_call_operand.hbm [shape: f32[128,128], index: 0, kind: input, shape index: {}]   ;;  %s3445_s1 = inlined_call_operand.hbm [shape: bf16[128,512], index: 1, kind: input, shape index: {}]   ;;  %s3446_s2 = inlined_call_operand.hbm [shape: bf16[128,512], index: 2, kind: input, shape index: {}]   ;;  %s3447_s3 = inlined_call_operand.hbm [shape: bf16[512,128], index: 3, kind: input, shape index: {}]   ;;  %s3448_s4 = inlined_call_operand.hbm [shape: f32[128,128], index: 4, kind: output, shape index: {}]  }
   0x1   :  { %10 = vsyncpa [#allocation6], 0 }
   0x2   :  { %11 = vsyncpa [#allocation9], 0 }
   0x3   :  { %12 = vsyncpa [#allocation4], 0  ;;  %s2818_s15 = smov [#allocation5]   ;;  %s2700_s19 = scalar_lea.hbm %s3445_s1, 4096 }
   0x4   :  { %s30_s16 = sshll.u32 %s2818_s15, 4  ;;  %p2701_p0 = scmp.ne.s32.totalorder %s3445_s1, %s2700_s19  ;;  %s31_s16 = int_to_ptr.vmem [resolvable:$true] %s30_s16 }
   0x5   :  { %p2704_p1 = scmp.lt.u32.totalorder %s2700_s19, %s3445_s1 }
   0x7   :  { %p2706_p2 = pnand %p2704_p1, %p2701_p0 }
   0x9   :  { %2709 = shalt.err (!%p2706_p2)
}
   0xa   :  { %s2710_s24 = scalar_lea.vmem %s31_s16, 4096  ;;  %p2715_p4 = scmp.lt.s32.totalorder %s31_s16, %s31_s16 }
   0xb   :  { %p2711_p3 = scmp.ne.s32.totalorder %s31_s16, %s2710_s24  ;;  %p2716_p5 = scmp.lt.s32.totalorder %s2710_s24, %s2710_s24 }
   0xd   :  { %p2717_p6 = por %p2716_p5, %p2715_p4 }
   0xf   :  { %p2718_p7 = pnand %p2717_p6, %p2711_p3 }
  0x11   :  { %2721 = shalt.err (!%p2718_p7)
}
  0x12   :  { %s2819_s25 = smov 256   ;;  %s2820_s26 = smov 16  }
  0x13   :  { %36 = dma.hbm_to_vmem [thread:$0]  %s3445_s1, 4096, %s31_s16, [#allocation6], %s2819_s25, %s2819_s25, %s2820_s26  }
  0x14   :  { %s2821_s29 = smov [#allocation2]   ;;  %s2722_s7 = scalar_lea.hbm %s3444_s0, 2048 }
  0x15   :  { %s18_s30 = sshll.u32 %s2821_s29, 4  ;;  %p2723_p8 = scmp.ne.s32.totalorder %s3444_s0, %s2722_s7  ;;  %s19_s30 = int_to_ptr.vmem [resolvable:$true] %s18_s30 }
  0x16   :  { %p2726_p9 = scmp.lt.u32.totalorder %s2722_s7, %s3444_s0 }
  0x18   :  { %p2728_p10 = pnand %p2726_p9, %p2723_p8 }
  0x1a   :  { %2731 = shalt.err (!%p2728_p10)
}
  0x1b   :  { %s2732_s12 = scalar_lea.vmem %s19_s30, 2048  ;;  %p2737_p12 = scmp.lt.s32.totalorder %s19_s30, %s19_s30 }
  0x1c   :  { %p2733_p11 = scmp.ne.s32.totalorder %s19_s30, %s2732_s12  ;;  %p2738_p13 = scmp.lt.s32.totalorder %s2732_s12, %s2732_s12 }
  0x1e   :  { %p2739_p0 = por %p2738_p13, %p2737_p12 }
  0x20   :  { %p2740_p1 = pnand %p2739_p0, %p2733_p11 }
  0x22   :  { %2743 = shalt.err (!%p2740_p1)
}
  0x23   :  { %s2822_s1 = smov 128   ;;  %s2823_s13 = smov 8  }
  0x24   :  { %24 = dma.hbm_to_vmem [thread:$0]  %s3444_s0, 2048, %s19_s30, [#allocation3], %s2822_s1, %s2822_s1, %s2823_s13  }
  0x25   :  { %s2824_s16 = smov [#allocation7]   ;;  %s2825_s18 = smov [#allocation8]  }
  0x26   :  { %s42_s17 = sshll.u32 %s2824_s16, 4  ;;  %s54_s19 = sshll.u32 %s2825_s18, 4  ;;  %s43_s17 = int_to_ptr.vmem [resolvable:$true] %s42_s17  ;;  %s2885_s19 = int_to_ptr.vmem [resolvable:$true] %s54_s19 }
  0x27   :  { %s2744_s22 = scalar_lea.hbm %s3446_s2, 4096 }
  0x28   :  { %p2745_p2 = scmp.ne.s32.totalorder %s3446_s2, %s2744_s22  ;;  %p2748_p3 = scmp.lt.u32.totalorder %s2744_s22, %s3446_s2 }
  0x2a   :  { %p2750_p4 = pnand %p2748_p3, %p2745_p2 }
  0x2c   :  { %2753 = shalt.err (!%p2750_p4)
}
  0x2d   :  { %s2754_s0 = scalar_lea.vmem %s43_s17, 4096  ;;  %p2759_p6 = scmp.lt.s32.totalorder %s43_s17, %s43_s17 }
  0x2e   :  { %p2755_p5 = scmp.ne.s32.totalorder %s43_s17, %s2754_s0  ;;  %p2760_p7 = scmp.lt.s32.totalorder %s2754_s0, %s2754_s0 }
  0x30   :  { %p2761_p8 = por %p2760_p7, %p2759_p6 }
  0x32   :  { %p2762_p9 = pnand %p2761_p8, %p2755_p5 }
  0x34   :  { %2765 = shalt.err (!%p2762_p9)
}
  0x35   :  { %48 = dma.hbm_to_vmem [thread:$0]  %s3446_s2, 4096, %s43_s17, [#allocation6], %s2819_s25, %s2819_s25, %s2820_s26  }
  0x36   :  { %s2766_s7 = scalar_lea.hbm %s3447_s3, 4096 }
  0x37   :  { %p2767_p10 = scmp.ne.s32.totalorder %s3447_s3, %s2766_s7  ;;  %p2770_p11 = scmp.lt.u32.totalorder %s2766_s7, %s3447_s3 }
  0x39   :  { %p2772_p12 = pnand %p2770_p11, %p2767_p10 }
  0x3b   :  { %2775 = shalt.err (!%p2772_p12)
}
  0x3c   :  { %s2776_s12 = scalar_lea.vmem %s2885_s19, 4096  ;;  %p2781_p0 = scmp.lt.s32.totalorder %s2885_s19, %s2885_s19 }
  0x3d   :  { %p2777_p13 = scmp.ne.s32.totalorder %s2885_s19, %s2776_s12  ;;  %p2782_p1 = scmp.lt.s32.totalorder %s2776_s12, %s2776_s12 }
  0x3f   :  { %p2783_p2 = por %p2782_p1, %p2781_p0 }
  0x41   :  { %p2784_p3 = pnand %p2783_p2, %p2777_p13 }
  0x43   :  { %2787 = shalt.err (!%p2784_p3)
}
  0x44   :  { %s2826_s2 = smov 64   ;;  %s2827_s25 = smov 4  }
  0x45   :  { %60 = dma.hbm_to_vmem [thread:$0]  %s3447_s3, 4096, %s2885_s19, [#allocation9], %s2826_s2, %s2826_s2, %s2827_s25  }
  0x46   :  { %2810 = dma.done.wait [#allocation3], 2048  }
  0x47   :  { %2811 = vsyncadd [#allocation3], 4294965248 }
  0x48   :  { %2812 = dma.done.wait [#allocation6], 8192  }
  0x49   :  { %2813 = vsyncadd [#allocation6], 4294959104 }
  0x4a   :  { %2814 = dma.done.wait [#allocation9], 4096  }
  0x4b   :  { %2815 = vsyncadd [#allocation9], 4294963200  ;;  %v2828_v0 = vmov 0   ;;  %v2316_v1 = vld [vmem:[#allocation5 + $0x4] ss:$16 sps:$4 sm:$0xff]   ;;  %v95_v34 = vld [vmem:[#allocation2 + $0x8] sm:$0xff] }
  0x4c   :  { %342 = vmatprep.mubr.bf16.mxu0 %v2828_v0  ;;  %455 = vmatprep.mubr.bf16.mxu1 %v2828_v0  ;;  %v2318_v2 = vld [vmem:[#allocation5 + $0xc] ss:$16 sps:$4 sm:$0xff]   ;;  %v2320_v3 = vld [vmem:[#allocation5] ss:$16 sps:$4 sm:$0xff]   ;;  %v2321_v4 = vld [vmem:[#allocation5 + $0x8] ss:$16 sps:$4 sm:$0xff]  }
  0x4d   :  { %310 = vmatprep.subr.bf16.mxu0 %v2316_v1  ;;  %423 = vmatprep.subr.bf16.mxu1 %v2318_v2  ;;  %v2322_v5 = vld [vmem:[#allocation5 + $0x24] ss:$16 sps:$4 sm:$0xff]   ;;  %v2324_v6 = vld [vmem:[#allocation5 + $0x2c] ss:$16 sps:$4 sm:$0xff]   ;;  %v2326_v7 = vld [vmem:[#allocation5 + $0x20] ss:$16 sps:$4 sm:$0xff]  }
  0x4e   :  { %311 = vmatpush1.bf16.msra.mxu0 %v2320_v3  ;;  %424 = vmatpush1.bf16.msra.mxu1 %v2321_v4  ;;  %v2327_v8 = vld [vmem:[#allocation5 + $0x28] ss:$16 sps:$4 sm:$0xff]   ;;  %v2328_v9 = vld [vmem:[#allocation5 + $0x44] ss:$16 sps:$4 sm:$0xff]   ;;  %v2330_v10 = vld [vmem:[#allocation5 + $0x4c] ss:$16 sps:$4 sm:$0xff]  }
  0x4f   :  { %312 = vmatprep.subr.bf16.mxu0 %v2322_v5  ;;  %425 = vmatprep.subr.bf16.mxu1 %v2324_v6  ;;  %v2332_v11 = vld [vmem:[#allocation5 + $0x40] ss:$16 sps:$4 sm:$0xff]   ;;  %v2333_v12 = vld [vmem:[#allocation5 + $0x48] ss:$16 sps:$4 sm:$0xff]   ;;  %v2334_v13 = vld [vmem:[#allocation5 + $0x64] ss:$16 sps:$4 sm:$0xff]  }
  0x50   :  { %v2336_v14 = vld [vmem:[#allocation5 + $0x6c] ss:$16 sps:$4 sm:$0xff]   ;;  %v2338_v15 = vld [vmem:[#allocation5 + $0x60] ss:$16 sps:$4 sm:$0xff]   ;;  %v2339_v16 = vld [vmem:[#allocation5 + $0x68] ss:$16 sps:$4 sm:$0xff]  }
  0x51   :  { %v2340_v17 = vld [vmem:[#allocation5 + $0x84] ss:$16 sps:$4 sm:$0xff]   ;;  %v2342_v18 = vld [vmem:[#allocation5 + $0x8c] ss:$16 sps:$4 sm:$0xff]   ;;  %v2344_v19 = vld [vmem:[#allocation5 + $0x80] ss:$16 sps:$4 sm:$0xff]  }
  0x52   :  { %313 = vmatpush1.bf16.msra.mxu0 %v2326_v7  ;;  %426 = vmatpush1.bf16.msra.mxu1 %v2327_v8  ;;  %v2345_v20 = vld [vmem:[#allocation5 + $0x88] ss:$16 sps:$4 sm:$0xff]   ;;  %v2346_v21 = vld [vmem:[#allocation5 + $0xa4] ss:$16 sps:$4 sm:$0xff]   ;;  %v2348_v22 = vld [vmem:[#allocation5 + $0xac] ss:$16 sps:$4 sm:$0xff]  }
  0x53   :  { %314 = vmatprep.subr.bf16.mxu0 %v2328_v9  ;;  %427 = vmatprep.subr.bf16.mxu1 %v2330_v10  ;;  %v2350_v23 = vld [vmem:[#allocation5 + $0xa0] ss:$16 sps:$4 sm:$0xff]   ;;  %v2351_v24 = vld [vmem:[#allocation5 + $0xa8] ss:$16 sps:$4 sm:$0xff]   ;;  %v2352_v25 = vld [vmem:[#allocation5 + $0xc4] ss:$16 sps:$4 sm:$0xff]  }
  0x54   :  { %v2354_v26 = vld [vmem:[#allocation5 + $0xcc] ss:$16 sps:$4 sm:$0xff]   ;;  %v2356_v27 = vld [vmem:[#allocation5 + $0xc0] ss:$16 sps:$4 sm:$0xff]   ;;  %v2357_v28 = vld [vmem:[#allocation5 + $0xc8] ss:$16 sps:$4 sm:$0xff]  }
  0x55   :  { %v2358_v29 = vld [vmem:[#allocation5 + $0xe4] ss:$16 sps:$4 sm:$0xff]   ;;  %v2360_v30 = vld [vmem:[#allocation5 + $0xec] ss:$16 sps:$4 sm:$0xff]   ;;  %v2362_v31 = vld [vmem:[#allocation5 + $0xe0] ss:$16 sps:$4 sm:$0xff]  }
  0x56   :  { %315 = vmatpush1.bf16.msra.mxu0 %v2332_v11  ;;  %428 = vmatpush1.bf16.msra.mxu1 %v2333_v12  ;;  %v2363_v32 = vld [vmem:[#allocation5 + $0xe8] ss:$16 sps:$4 sm:$0xff]   ;;  %v94_v33 = vld [vmem:[#allocation2] sm:$0xff]  ;;  %v2369_v36 = vld [vmem:[#allocation7 + $0xc] ss:$16 sps:$4 sm:$0xff]   ;;  %s2829_s3 = smov [#allocation10]  }
  0x57   :  { %316 = vmatprep.subr.bf16.mxu0 %v2334_v13  ;;  %429 = vmatprep.subr.bf16.mxu1 %v2336_v14  ;;  %v2366_v35 = vld [vmem:[#allocation7 + $0x4] ss:$16 sps:$4 sm:$0xff]   ;;  %v2921_v37 = vpack.c.bf16 %v95_v34, %v94_v33  ;;  %v2364_v38 = vld [vmem:[#allocation7] ss:$16 sps:$4 sm:$0xff]   ;;  %v2367_v39 = vld [vmem:[#allocation7 + $0x8] ss:$16 sps:$4 sm:$0xff]  }
  0x58   :  { %v96_v40 = vld [vmem:[#allocation2 + $0x10] sm:$0xff]  ;;  %v2375_v42 = vld [vmem:[#allocation7 + $0x2c] ss:$16 sps:$4 sm:$0xff]   ;;  %v2373_v45 = vld [vmem:[#allocation7 + $0x28] ss:$16 sps:$4 sm:$0xff]   ;;  %s2001_s15 = sshll.u32 %s2829_s3, 4  ;;  %s2002_s15 = int_to_ptr.vmem [resolvable:$true] %s2001_s15 }
  0x59   :  { %v2372_v41 = vld [vmem:[#allocation7 + $0x24] ss:$16 sps:$4 sm:$0xff]   ;;  %v97_v43 = vld [vmem:[#allocation2 + $0x18] sm:$0xff]  ;;  %v2370_v44 = vld [vmem:[#allocation7 + $0x20] ss:$16 sps:$4 sm:$0xff]   ;;  %s2788_s16 = scalar_lea.vmem %s2002_s15, 2048  ;;  %p2793_p5 = scmp.lt.s32.totalorder %s2002_s15, %s2002_s15 }
  0x5a   :  { %317 = vmatpush1.bf16.msra.mxu0 %v2338_v15  ;;  %430 = vmatpush1.bf16.msra.mxu1 %v2339_v16  ;;  %v2378_v46 = vld [vmem:[#allocation7 + $0x44] ss:$16 sps:$4 sm:$0xff]   ;;  %v2381_v47 = vld [vmem:[#allocation7 + $0x4c] ss:$16 sps:$4 sm:$0xff]   ;;  %v2927_v48 = vpack.c.bf16 %v97_v43, %v96_v40  ;;  %v2376_v49 = vld [vmem:[#allocation7 + $0x40] ss:$16 sps:$4 sm:$0xff]   ;;  %p2789_p4 = scmp.ne.s32.totalorder %s2002_s15, %s2788_s16  ;;  %p2794_p6 = scmp.lt.s32.totalorder %s2788_s16, %s2788_s16 }
  0x5b   :  { %318 = vmatprep.subr.bf16.mxu0 %v2340_v17  ;;  %431 = vmatprep.subr.bf16.mxu1 %v2342_v18  ;;  %v2379_v50 = vld [vmem:[#allocation7 + $0x48] ss:$16 sps:$4 sm:$0xff]   ;;  %v2384_v51 = vld [vmem:[#allocation7 + $0x64] ss:$16 sps:$4 sm:$0xff]   ;;  %v2387_v52 = vld [vmem:[#allocation7 + $0x6c] ss:$16 sps:$4 sm:$0xff]  }
  0x5c   :  { %v98_v53 = vld [vmem:[#allocation2 + $0x20] sm:$0xff]  ;;  %v99_v54 = vld [vmem:[#allocation2 + $0x28] sm:$0xff]  ;;  %v100_v1 = vld [vmem:[#allocation2 + $0x30] sm:$0xff]  ;;  %p2795_p7 = por %p2794_p6, %p2793_p5 }
  0x5d   :  { %v2382_v55 = vld [vmem:[#allocation7 + $0x60] ss:$16 sps:$4 sm:$0xff]   ;;  %v2385_v56 = vld [vmem:[#allocation7 + $0x68] ss:$16 sps:$4 sm:$0xff]   ;;  %v2390_v57 = vld [vmem:[#allocation7 + $0x84] ss:$16 sps:$4 sm:$0xff]   ;;  %v2933_v59 = vpack.c.bf16 %v99_v54, %v98_v53 }
  0x5e   :  { %319 = vmatpush1.bf16.msra.mxu0 %v2344_v19  ;;  %432 = vmatpush1.bf16.msra.mxu1 %v2345_v20  ;;  %v2393_v58 = vld [vmem:[#allocation7 + $0x8c] ss:$16 sps:$4 sm:$0xff]   ;;  %v2388_v60 = vld [vmem:[#allocation7 + $0x80] ss:$16 sps:$4 sm:$0xff]   ;;  %v2391_v61 = vld [vmem:[#allocation7 + $0x88] ss:$16 sps:$4 sm:$0xff]   ;;  %p2796_p8 = pnand %p2795_p7, %p2789_p4 }
  0x5f   :  { %320 = vmatprep.subr.bf16.mxu0 %v2346_v21  ;;  %433 = vmatprep.subr.bf16.mxu1 %v2348_v22  ;;  %v2396_v62 = vld [vmem:[#allocation7 + $0xa4] ss:$16 sps:$4 sm:$0xff]   ;;  %v2399_v63 = vld [vmem:[#allocation7 + $0xac] ss:$16 sps:$4 sm:$0xff]   ;;  %v2394_v3 = vld [vmem:[#allocation7 + $0xa0] ss:$16 sps:$4 sm:$0xff]  }
  0x60   :  { %v101_v2 = vld [vmem:[#allocation2 + $0x38] sm:$0xff]  ;;  %v2402_v5 = vld [vmem:[#allocation7 + $0xc4] ss:$16 sps:$4 sm:$0xff]   ;;  %v2400_v8 = vld [vmem:[#allocation7 + $0xc0] ss:$16 sps:$4 sm:$0xff]  }
  0x61   :  { %v2397_v4 = vld [vmem:[#allocation7 + $0xa8] ss:$16 sps:$4 sm:$0xff]   ;;  %v2405_v6 = vld [vmem:[#allocation7 + $0xcc] ss:$16 sps:$4 sm:$0xff]   ;;  %v113_v7 = vpack.c.bf16 %v101_v2, %v100_v1  ;;  %v2408_v10 = vld [vmem:[#allocation7 + $0xe4] ss:$16 sps:$4 sm:$0xff]  }
  0x62   :  { %321 = vmatpush1.bf16.msra.mxu0 %v2350_v23  ;;  %434 = vmatpush1.bf16.msra.mxu1 %v2351_v24  ;;  %v2403_v9 = vld [vmem:[#allocation7 + $0xc8] ss:$16 sps:$4 sm:$0xff]   ;;  %v2411_v11 = vld [vmem:[#allocation7 + $0xec] ss:$16 sps:$4 sm:$0xff]   ;;  %v102_v12 = vld [vmem:[#allocation2 + $0x40] sm:$0xff] }
  0x63   :  { %322 = vmatprep.subr.bf16.mxu0 %v2352_v25  ;;  %435 = vmatprep.subr.bf16.mxu1 %v2354_v26  ;;  %v103_v13 = vld [vmem:[#allocation2 + $0x48] sm:$0xff]  ;;  %v2406_v14 = vld [vmem:[#allocation7 + $0xe0] ss:$16 sps:$4 sm:$0xff]   ;;  %v105_v18 = vld [vmem:[#allocation2 + $0x58] sm:$0xff] }
  0x64   :  { %v2409_v15 = vld [vmem:[#allocation7 + $0xe8] ss:$16 sps:$4 sm:$0xff]   ;;  %v114_v16 = vpack.c.bf16 %v103_v13, %v102_v12  ;;  %v104_v17 = vld [vmem:[#allocation2 + $0x50] sm:$0xff]  ;;  %v106_v20 = vld [vmem:[#allocation2 + $0x60] sm:$0xff] }
  0x65   :  { %v115_v19 = vpack.c.bf16 %v105_v18, %v104_v17  ;;  %v107_v21 = vld [vmem:[#allocation2 + $0x68] sm:$0xff]  ;;  %v108_v23 = vld [vmem:[#allocation2 + $0x70] sm:$0xff]  ;;  %v109_v24 = vld [vmem:[#allocation2 + $0x78] sm:$0xff] }
  0x66   :  { %323 = vmatpush1.bf16.msra.mxu0 %v2356_v27  ;;  %436 = vmatpush1.bf16.msra.mxu1 %v2357_v28  ;;  %v116_v22 = vpack.c.bf16 %v107_v21, %v106_v20  ;;  %v117_v25 = vpack.c.bf16 %v109_v24, %v108_v23  ;;  %v2412_v26 = vld [vmem:[#allocation8 + $0x40] sm:$0xff]   ;;  %v2419_v33 = vld [vmem:[#allocation8 + $0x88] sm:$0xff]   ;;  %v2420_v34 = vld [vmem:[#allocation8 + $0x50] sm:$0xff]  }
  0x67   :  { %324 = vmatprep.subr.bf16.mxu0 %v2358_v29  ;;  %437 = vmatprep.subr.bf16.mxu1 %v2360_v30  ;;  %v2413_v27 = vld [vmem:[#allocation8 + $0xc0] sm:$0xff]   ;;  %v2416_v30 = vld [vmem:[#allocation8 + $0x48] sm:$0xff]   ;;  %v2427_v40 = vld [vmem:[#allocation8 + $0x98] sm:$0xff]  }
  0x68   :  { %v2414_v28 = vld [vmem:[#allocation8] sm:$0xff]   ;;  %v2440_v53 = vld [vmem:[#allocation8 + $0x78] sm:$0xff]  }
  0x69   :  { %v2415_v29 = vld [vmem:[#allocation8 + $0x80] sm:$0xff]   ;;  %v2441_v54 = vld [vmem:[#allocation8 + $0xf8] sm:$0xff]  }
  0x6a   :  { %325 = vmatpush1.bf16.msra.mxu0 %v2362_v31  ;;  %438 = vmatpush1.bf16.msra.mxu1 %v2363_v32  ;;  %v2417_v31 = vld [vmem:[#allocation8 + $0xc8] sm:$0xff]   ;;  %v2430_v43 = vld [vmem:[#allocation8 + $0x20] sm:$0xff]  }
  0x6b   :  { %728 = vmatprep.subr.bf16.mxu0 %v2366_v35  ;;  %841 = vmatprep.subr.bf16.mxu1 %v2369_v36  ;;  %v2418_v32 = vld [vmem:[#allocation8 + $0x8] sm:$0xff]   ;;  %v2422_v35 = vld [vmem:[#allocation8 + $0x10] sm:$0xff]  }
  0x6c   :  { %v2423_v36 = vld [vmem:[#allocation8 + $0x90] sm:$0xff]  }
  0x6d   :  { %343 = vmatmul.mubr.bf16.vlgmr.msra.gmra.mrb[0].mxu0 %v2921_v37  ;;  %456 = vmatmul.mubr.bf16.vlgmr.msra.gmra.mrb[0].mxu1 %v2921_v37 }
  0x6e   :  { %729 = vmatpush1.bf16.msra.mxu0 %v2364_v38  ;;  %842 = vmatpush1.bf16.msra.mxu1 %v2367_v39  ;;  %v2425_v38 = vld [vmem:[#allocation8 + $0xd8] sm:$0xff]  }
  0x6f   :  { %352 = vmatprep.mubr.bf16.mxu0 %v2828_v0  ;;  %465 = vmatprep.mubr.bf16.mxu1 %v2828_v0  ;;  %v2426_v39 = vld [vmem:[#allocation8 + $0x18] sm:$0xff]  }
  0x70   :  { %730 = vmatprep.subr.bf16.mxu0 %v2372_v41  ;;  %843 = vmatprep.subr.bf16.mxu1 %v2375_v42  ;;  %v2428_v41 = vld [vmem:[#allocation8 + $0x60] sm:$0xff]  }
  0x71   :  { %v2429_v42 = vld [vmem:[#allocation8 + $0xe0] sm:$0xff]  }
  0x72   :  { %731 = vmatpush1.bf16.msra.mxu0 %v2370_v44  ;;  %844 = vmatpush1.bf16.msra.mxu1 %v2373_v45  ;;  %v2431_v44 = vld [vmem:[#allocation8 + $0xa0] sm:$0xff]   ;;  %v2432_v45 = vld [vmem:[#allocation8 + $0x68] sm:$0xff]  }
  0x73   :  { %732 = vmatprep.subr.bf16.mxu0 %v2378_v46  ;;  %845 = vmatprep.subr.bf16.mxu1 %v2381_v47  ;;  %v2433_v46 = vld [vmem:[#allocation8 + $0xe8] sm:$0xff]  }
  0x74   :  { %v2434_v47 = vld [vmem:[#allocation8 + $0x28] sm:$0xff]  }
  0x75   :  { %353 = vmatmul.mubr.bf16.gmra.mrb[4].mxu0 %v2927_v48  ;;  %466 = vmatmul.mubr.bf16.gmra.mrb[4].mxu1 %v2927_v48 }
  0x76   :  { %362 = vmatprep.mubr.bf16.mxu0 %v2828_v0  ;;  %475 = vmatprep.mubr.bf16.mxu1 %v2828_v0 }
  0x77   :  { %733 = vmatpush1.bf16.msra.mxu0 %v2376_v49  ;;  %846 = vmatpush1.bf16.msra.mxu1 %v2379_v50  ;;  %v2436_v49 = vld [vmem:[#allocation8 + $0x70] sm:$0xff]  }
  0x78   :  { %734 = vmatprep.subr.bf16.mxu0 %v2384_v51  ;;  %847 = vmatprep.subr.bf16.mxu1 %v2387_v52  ;;  %v2437_v50 = vld [vmem:[#allocation8 + $0xf0] sm:$0xff]  }
  0x79   :  { %v2438_v51 = vld [vmem:[#allocation8 + $0x30] sm:$0xff]  }
  0x7a   :  { %v2439_v52 = vld [vmem:[#allocation8 + $0xb0] sm:$0xff]  }
  0x7b   :  { %735 = vmatpush1.bf16.msra.mxu0 %v2382_v55  ;;  %848 = vmatpush1.bf16.msra.mxu1 %v2385_v56  ;;  %v2442_v55 = vld [vmem:[#allocation8 + $0x38] sm:$0xff]  }
  0x7c   :  { %736 = vmatprep.subr.bf16.mxu0 %v2390_v57  ;;  %849 = vmatprep.subr.bf16.mxu1 %v2393_v58  ;;  %v2443_v56 = vld [vmem:[#allocation8 + $0xb8] sm:$0xff]  }
  0x7d   :  { %363 = vmatmul.mubr.bf16.gmra.mrb[8].mxu0 %v2933_v59  ;;  %476 = vmatmul.mubr.bf16.gmra.mrb[8].mxu1 %v2933_v59 }
  0x7e   :  { %372 = vmatprep.mubr.bf16.mxu0 %v2828_v0  ;;  %485 = vmatprep.mubr.bf16.mxu1 %v2828_v0 }
  0x7f   :  { %737 = vmatpush1.bf16.msra.mxu0 %v2388_v60  ;;  %850 = vmatpush1.bf16.msra.mxu1 %v2391_v61 }
  0x80   :  { %738 = vmatprep.subr.bf16.mxu0 %v2396_v62  ;;  %851 = vmatprep.subr.bf16.mxu1 %v2399_v63 }
  0x83   :  { %739 = vmatpush1.bf16.msra.mxu0 %v2394_v3  ;;  %852 = vmatpush1.bf16.msra.mxu1 %v2397_v4 }
  0x84   :  { %740 = vmatprep.subr.bf16.mxu0 %v2402_v5  ;;  %853 = vmatprep.subr.bf16.mxu1 %v2405_v6 }
  0x85   :  { %373 = vmatmul.mubr.bf16.gmra.mrb[12].mxu0 %v113_v7  ;;  %486 = vmatmul.mubr.bf16.gmra.mrb[12].mxu1 %v113_v7 }
  0x86   :  { %382 = vmatprep.mubr.bf16.mxu0 %v2828_v0  ;;  %495 = vmatprep.mubr.bf16.mxu1 %v2828_v0 }
  0x87   :  { %741 = vmatpush1.bf16.msra.mxu0 %v2400_v8  ;;  %854 = vmatpush1.bf16.msra.mxu1 %v2403_v9 }
  0x88   :  { %742 = vmatprep.subr.bf16.mxu0 %v2408_v10  ;;  %855 = vmatprep.subr.bf16.mxu1 %v2411_v11 }
  0x8b   :  { %743 = vmatpush1.bf16.msra.mxu0 %v2406_v14  ;;  %856 = vmatpush1.bf16.msra.mxu1 %v2409_v15 }
  0x8c   :  { %2175 = vmatprep.subr.bf16.mxu0 %v2412_v26  ;;  %2239 = vmatprep.subr.bf16.mxu1 %v2413_v27 }
  0x8d   :  { %383 = vmatmul.mubr.bf16.gmra.mrb[16].mxu0 %v114_v16  ;;  %496 = vmatmul.mubr.bf16.gmra.mrb[16].mxu1 %v114_v16 }
  0x8e   :  { %392 = vmatprep.mubr.bf16.mxu0 %v2828_v0  ;;  %505 = vmatprep.mubr.bf16.mxu1 %v2828_v0 }
  0x95   :  { %393 = vmatmul.mubr.bf16.gmra.mrb[20].mxu0 %v115_v19  ;;  %506 = vmatmul.mubr.bf16.gmra.mrb[20].mxu1 %v115_v19 }
  0x96   :  { %402 = vmatprep.mubr.bf16.mxu0 %v2828_v0  ;;  %515 = vmatprep.mubr.bf16.mxu1 %v2828_v0 }
  0x9d   :  { %403 = vmatmul.mubr.bf16.gmra.mrb[24].mxu0 %v116_v22  ;;  %516 = vmatmul.mubr.bf16.gmra.mrb[24].mxu1 %v116_v22 }
  0x9e   :  { %412 = vmatprep.mubr.bf16.mxu0 %v2828_v0  ;;  %525 = vmatprep.mubr.bf16.mxu1 %v2828_v0 }
  0xa5   :  { %413 = vmatmul.mubr.bf16.gmra.mrb[28].mxu0 %v117_v25  ;;  %526 = vmatmul.mubr.bf16.gmra.mrb[28].mxu1 %v117_v25 }
  0xa6   :  { %760 = vmatprep.mubr.bf16.mxu0 %v2828_v0  ;;  %873 = vmatprep.mubr.bf16.mxu1 %v2828_v0 }
  0xad   :  { %761 = vmatmul.mubr.bf16.vlgmr.msra.gmra.mrb[32].mxu0 %v2921_v37  ;;  %874 = vmatmul.mubr.bf16.vlgmr.msra.gmra.mrb[32].mxu1 %v2921_v37  ;;  %v2424_v37 = vld [vmem:[#allocation8 + $0x58] sm:$0xff]  }
  0xae   :  { %770 = vmatprep.mubr.bf16.mxu0 %v2828_v0  ;;  %883 = vmatprep.mubr.bf16.mxu1 %v2828_v0 }
  0xaf   :  { %2176 = vmatpush3.bf16.msra.mxu0 %v2414_v28  ;;  %2240 = vmatpush3.bf16.msra.mxu1 %v2415_v29 }
  0xb0   :  { %2177 = vmatprep.subr.bf16.mxu0 %v2416_v30  ;;  %2241 = vmatprep.subr.bf16.mxu1 %v2417_v31 }
  0xb3   :  { %2178 = vmatpush3.bf16.msra.mxu0 %v2418_v32  ;;  %2242 = vmatpush3.bf16.msra.mxu1 %v2419_v33 }
  0xb4   :  { %2179 = vmatprep.subr.bf16.mxu0 %v2420_v34 }
  0xb5   :  { %771 = vmatmul.mubr.bf16.gmra.mrb[36].mxu0 %v2927_v48  ;;  %884 = vmatmul.mubr.bf16.gmra.mrb[36].mxu1 %v2927_v48  ;;  %v2435_v48 = vld [vmem:[#allocation8 + $0xa8] sm:$0xff]  }
  0xb6   :  { %780 = vmatprep.mubr.bf16.mxu0 %v2828_v0  ;;  %893 = vmatprep.mubr.bf16.mxu1 %v2828_v0 }
  0xb7   :  { %2180 = vmatpush3.bf16.msra.mxu0 %v2422_v35 }
  0xb8   :  { %2181 = vmatprep.subr.bf16.mxu0 %v2424_v37 }
  0xbb   :  { %2182 = vmatpush3.bf16.msra.mxu0 %v2426_v39 }
  0xbc   :  { %2183 = vmatprep.subr.bf16.mxu0 %v2428_v41 }
  0xbd   :  { %781 = vmatmul.mubr.bf16.gmra.mrb[40].mxu0 %v2933_v59  ;;  %894 = vmatmul.mubr.bf16.gmra.mrb[40].mxu1 %v2933_v59 }
  0xbe   :  { %790 = vmatprep.mubr.bf16.mxu0 %v2828_v0  ;;  %903 = vmatprep.mubr.bf16.mxu1 %v2828_v0 }
  0xbf   :  { %2184 = vmatpush3.bf16.msra.mxu0 %v2430_v43 }
  0xc0   :  { %2185 = vmatprep.subr.bf16.mxu0 %v2432_v45 }
  0xc3   :  { %2186 = vmatpush3.bf16.msra.mxu0 %v2434_v47 }
  0xc4   :  { %2187 = vmatprep.subr.bf16.mxu0 %v2436_v49 }
  0xc5   :  { %791 = vmatmul.mubr.bf16.gmra.mrb[44].mxu0 %v113_v7  ;;  %904 = vmatmul.mubr.bf16.gmra.mrb[44].mxu1 %v113_v7 }
  0xc6   :  { %800 = vmatprep.mubr.bf16.mxu0 %v2828_v0  ;;  %913 = vmatprep.mubr.bf16.mxu1 %v2828_v0 }
  0xc7   :  { %2188 = vmatpush3.bf16.msra.mxu0 %v2438_v51 }
  0xc8   :  { %2189 = vmatprep.subr.bf16.mxu0 %v2440_v53 }
  0xcb   :  { %2190 = vmatpush3.bf16.msra.mxu0 %v2442_v55 }
  0xcd   :  { %801 = vmatmul.mubr.bf16.gmra.mrb[48].mxu0 %v114_v16  ;;  %914 = vmatmul.mubr.bf16.gmra.mrb[48].mxu1 %v114_v16 }
  0xce   :  { %810 = vmatprep.mubr.bf16.mxu0 %v2828_v0  ;;  %923 = vmatprep.mubr.bf16.mxu1 %v2828_v0 }
  0xd5   :  { %811 = vmatmul.mubr.bf16.gmra.mrb[52].mxu0 %v115_v19  ;;  %924 = vmatmul.mubr.bf16.gmra.mrb[52].mxu1 %v115_v19 }
  0xd6   :  { %820 = vmatprep.mubr.bf16.mxu0 %v2828_v0  ;;  %933 = vmatprep.mubr.bf16.mxu1 %v2828_v0 }
  0xdd   :  { %821 = vmatmul.mubr.bf16.gmra.mrb[56].mxu0 %v116_v22  ;;  %934 = vmatmul.mubr.bf16.gmra.mrb[56].mxu1 %v116_v22 }
  0xde   :  { %830 = vmatprep.mubr.bf16.mxu0 %v2828_v0  ;;  %943 = vmatprep.mubr.bf16.mxu1 %v2828_v0  ;;  %v2421_v0 = vld [vmem:[#allocation8 + $0xd0] sm:$0xff]  }
  0xdf   :  { %2243 = vmatprep.subr.bf16.mxu1 %v2421_v0 }
  0xe0   :  { %2244 = vmatpush3.bf16.msra.mxu1 %v2423_v36 }
  0xe1   :  { %2245 = vmatprep.subr.bf16.mxu1 %v2425_v38 }
  0xe4   :  { %2246 = vmatpush3.bf16.msra.mxu1 %v2427_v40 }
  0xe5   :  { %831 = vmatmul.mubr.bf16.gmra.mrb[60].mxu0 %v117_v25  ;;  %944 = vmatmul.mubr.bf16.gmra.mrb[60].mxu1 %v117_v25 }
  0xe6   :  { %2247 = vmatprep.subr.bf16.mxu1 %v2429_v42 }
  0xe8   :  { %2248 = vmatpush3.bf16.msra.mxu1 %v2431_v44 }
  0xe9   :  { %2249 = vmatprep.subr.bf16.mxu1 %v2433_v46 }
  0xec   :  { %2250 = vmatpush3.bf16.msra.mxu1 %v2435_v48 }
  0xed   :  { %2251 = vmatprep.subr.bf16.mxu1 %v2437_v50 }
  0xf0   :  { %2252 = vmatpush3.bf16.msra.mxu1 %v2439_v52 }
  0xf1   :  { %2253 = vmatprep.subr.bf16.mxu1 %v2441_v54 }
  0xf4   :  { %2254 = vmatpush3.bf16.msra.mxu1 %v2443_v56 }
 0x140   :  { %v2969_v57 = vpop.f32.mrb[0].mxu0  ;;  %v2971_v58 = vpop.f32.mrb[0].mxu1 }
 0x141   :  { %v2079_v59 = vmul.f32 -1.442695, %v2969_v57  ;;  %v2081_v60 = vmul.f32 -1.442695, %v2971_v58  ;;  %v2975_v61 = vpop.f32.mrb[1].mxu0  ;;  %v2977_v62 = vpop.f32.mrb[1].mxu1 }
 0x142   :  { %v2080_v63 = vmul.f32 -1.442695, %v2975_v61  ;;  %v2082_v1 = vmul.f32 -1.442695, %v2977_v62  ;;  %v2981_v2 = vpop.f32.mrb[2].mxu0  ;;  %v2983_v3 = vpop.f32.mrb[2].mxu1 }
 0x143   :  { %2444 = vpow2.f32 %v2079_v59  ;;  %v2083_v4 = vmul.f32 -1.442695, %v2981_v2  ;;  %v2986_v5 = vpop.f32.mrb[3].mxu0  ;;  %v2988_v6 = vpop.f32.mrb[3].mxu1  ;;  %v2085_v7 = vmul.f32 -1.442695, %v2983_v3 }
 0x144   :  { %2446 = vpow2.f32 %v2081_v60  ;;  %v2084_v8 = vmul.f32 -1.442695, %v2986_v5  ;;  %v2086_v9 = vmul.f32 -1.442695, %v2988_v6 }
 0x145   :  { %2448 = vpow2.f32 %v2080_v63 }
 0x146   :  { %2450 = vpow2.f32 %v2082_v1 }
 0x147   :  { %2452 = vpow2.f32 %v2083_v4 }
 0x148   :  { %2454 = vpow2.f32 %v2085_v7  ;;  %v2993_v10 = vpop.f32.mrb[4].mxu0  ;;  %v2995_v11 = vpop.f32.mrb[4].mxu1 }
 0x149   :  { %2456 = vpow2.f32 %v2084_v8  ;;  %v2087_v12 = vmul.f32 -1.442695, %v2993_v10  ;;  %v2089_v13 = vmul.f32 -1.442695, %v2995_v11  ;;  %v2999_v14 = vpop.f32.mrb[5].mxu0  ;;  %v3001_v15 = vpop.f32.mrb[5].mxu1 }
 0x14a   :  { %2458 = vpow2.f32 %v2086_v9  ;;  %v2088_v16 = vmul.f32 -1.442695, %v2999_v14  ;;  %v2090_v17 = vmul.f32 -1.442695, %v3001_v15  ;;  %v3005_v18 = vpop.f32.mrb[6].mxu0  ;;  %v3007_v19 = vpop.f32.mrb[6].mxu1 }
 0x14b   :  { %3491 = vst [vmem:[#allocation15_spill] sm:$0xff] %v3007_v19  ;;  %2460 = vpow2.f32 %v2087_v12  ;;  %v2091_v20 = vmul.f32 -1.442695, %v3005_v18  ;;  %v3010_v21 = vpop.f32.mrb[7].mxu0  ;;  %v3012_v22 = vpop.f32.mrb[7].mxu1 }
 0x14c   :  { %3492 = vst [vmem:[#allocation16_spill] sm:$0xff] %v3010_v21  ;;  %3493 = vst [vmem:[#allocation17_spill] sm:$0xff] %v3012_v22  ;;  %2462 = vpow2.f32 %v2089_v13  ;;  %v2093_v59 = vmul.f32 -1.442695, %v3007_v19  ;;  %v2092_v4 = vmul.f32 -1.442695, %v3010_v21 }
 0x14d   :  { %v2445_v23 = vpop.eup %2444  ;;  %2464 = vpow2.f32 %v2088_v16  ;;  %v2094_v12 = vmul.f32 -1.442695, %v3012_v22 }
 0x14e   :  { %v2447_v24 = vpop.eup %2446  ;;  %v1146_v25 = vadd.f32 1.0, %v2445_v23  ;;  %2466 = vpow2.f32 %v2090_v17 }
 0x14f   :  { %v2449_v26 = vpop.eup %2448  ;;  %v1148_v27 = vadd.f32 1.0, %v2447_v24  ;;  %2468 = vpow2.f32 %v2091_v20 }
 0x150   :  { %v2451_v28 = vpop.eup %2450  ;;  %2470 = vrcp.f32 %v1146_v25  ;;  %v1147_v29 = vadd.f32 1.0, %v2449_v26  ;;  %v3014_v30 = vpop.f32.mrb[8].mxu0 }
 0x151   :  { %3494 = vst [vmem:[#allocation18_spill] sm:$0xff] %v3014_v30  ;;  %v3016_v31 = vpop.f32.mrb[8].mxu1  ;;  %v2453_v32 = vpop.eup %2452  ;;  %2472 = vrcp.f32 %v1148_v27  ;;  %v1149_v33 = vadd.f32 1.0, %v2451_v28  ;;  %v2095_v20 = vmul.f32 -1.442695, %v3014_v30 }
 0x152   :  { %3495 = vst [vmem:[#allocation19_spill] sm:$0xff] %v3016_v31  ;;  %v3018_v34 = vpop.f32.mrb[9].mxu0  ;;  %v2455_v0 = vpop.eup %2454  ;;  %2474 = vrcp.f32 %v1147_v29  ;;  %v1150_v35 = vadd.f32 1.0, %v2453_v32  ;;  %v2097_v25 = vmul.f32 -1.442695, %v3016_v31 }
 0x153   :  { %3496 = vst [vmem:[#allocation20_spill] sm:$0xff] %v3018_v34  ;;  %v3020_v36 = vpop.f32.mrb[9].mxu1  ;;  %v3022_v37 = vpop.f32.mrb[10].mxu0  ;;  %2476 = vrcp.f32 %v1149_v33  ;;  %v1152_v39 = vadd.f32 1.0, %v2455_v0  ;;  %v2096_v27 = vmul.f32 -1.442695, %v3018_v34 }
 0x154   :  { %3497 = vst [vmem:[#allocation21_spill] sm:$0xff] %v3020_v36  ;;  %3498 = vst [vmem:[#allocation22_spill] sm:$0xff] %v3022_v37  ;;  %v2457_v38 = vpop.eup %2456  ;;  %v3024_v40 = vpop.f32.mrb[10].mxu1  ;;  %2478 = vrcp.f32 %v1150_v35  ;;  %v2098_v29 = vmul.f32 -1.442695, %v3020_v36 }
 0x155   :  { %3499 = vst [vmem:[#allocation23_spill] sm:$0xff] %v3024_v40  ;;  %v2459_v41 = vpop.eup %2458  ;;  %v1151_v42 = vadd.f32 1.0, %v2457_v38  ;;  %v3026_v43 = vpop.f32.mrb[11].mxu0  ;;  %2480 = vrcp.f32 %v1152_v39  ;;  %v2099_v33 = vmul.f32 -1.442695, %v3022_v37 }
 0x156   :  { %3500 = vst [vmem:[#allocation24_spill] sm:$0xff] %v3026_v43  ;;  %v3028_v44 = vpop.f32.mrb[11].mxu1  ;;  %v2461_v45 = vpop.eup %2460  ;;  %v1153_v46 = vadd.f32 1.0, %v2459_v41  ;;  %v2101_v39 = vmul.f32 -1.442695, %v3024_v40 }
 0x157   :  { %3501 = vst [vmem:[#allocation25_spill] sm:$0xff] %v3028_v44  ;;  %v2463_v47 = vpop.eup %2462  ;;  %2482 = vrcp.f32 %v1151_v42  ;;  %v1154_v48 = vadd.f32 1.0, %v2461_v45 }
 0x158   :  { %v2465_v49 = vpop.eup %2464  ;;  %2484 = vrcp.f32 %v1153_v46  ;;  %v1156_v50 = vadd.f32 1.0, %v2463_v47  ;;  %v3030_v53 = vpop.f32.mrb[12].mxu0  ;;  %v2100_v46 = vmul.f32 -1.442695, %v3026_v43 }
 0x159   :  { %v2467_v51 = vpop.eup %2466  ;;  %2486 = vrcp.f32 %v1154_v48  ;;  %v1155_v52 = vadd.f32 1.0, %v2465_v49  ;;  %3502 = vst [vmem:[#allocation26_spill] sm:$0xff] %v3030_v53  ;;  %v3032_v54 = vpop.f32.mrb[12].mxu1 }
 0x15a   :  { %3503 = vst [vmem:[#allocation27_spill] sm:$0xff] %v3032_v54  ;;  %v2469_v55 = vpop.eup %2468  ;;  %2488 = vrcp.f32 %v1156_v50  ;;  %v1157_v56 = vadd.f32 1.0, %v2467_v51  ;;  %v3035_v60 = vpop.f32.mrb[13].mxu0  ;;  %v2102_v50 = vmul.f32 -1.442695, %v3028_v44 }
 0x15b   :  { %v3037_v63 = vpop.eup %2470  ;;  %2490 = vrcp.f32 %v1155_v52  ;;  %v1158_v1 = vadd.f32 1.0, %v2469_v55  ;;  %v3040_v7 = vpop.f32.mrb[13].mxu1 }
 0x15c   :  { %v3042_v8 = vpop.f32.mrb[14].mxu0  ;;  %v3044_v9 = vpop.eup %2472  ;;  %2492 = vrcp.f32 %v1157_v56  ;;  %v2103_v56 = vmul.f32 -1.442695, %v3030_v53 }
 0x15d   :  { %v3047_v13 = vpop.f32.mrb[14].mxu1  ;;  %v3049_v16 = vpop.f32.mrb[15].mxu0  ;;  %2494 = vrcp.f32 %v1158_v1  ;;  %v2105_v1 = vmul.f32 -1.442695, %v3032_v54 }
 0x15e   :  { %v3051_v17 = vpop.eup %2474  ;;  %v3054_v23 = vpop.f32.mrb[15].mxu1  ;;  %2496 = vpow2.f32 %v2093_v59 }
 0x15f   :  { %v3056_v24 = vpop.eup %2476  ;;  %2498 = vpow2.f32 %v2092_v4 }
 0x160   :  { %v3059_v26 = vpop.eup %2478  ;;  %2500 = vpow2.f32 %v2094_v12  ;;  %v3068_v0 = vpop.f32.mrb[16].mxu0 }
 0x161   :  { %v3062_v28 = vpop.eup %2480  ;;  %2502 = vpow2.f32 %v2095_v20  ;;  %v3070_v35 = vpop.f32.mrb[16].mxu1 }
 0x162   :  { %v3065_v32 = vpop.eup %2482  ;;  %2504 = vpow2.f32 %v2097_v25  ;;  %v3075_v41 = vpop.f32.mrb[17].mxu0 }
 0x163   :  { %v3072_v38 = vpop.eup %2484  ;;  %3504 = vst [vmem:[#allocation28_spill] sm:$0xff] %v3075_v41  ;;  %v3077_v42 = vpop.f32.mrb[17].mxu1  ;;  %2506 = vpow2.f32 %v2096_v27 }
 0x164   :  { %3505 = vst [vmem:[#allocation29_spill] sm:$0xff] %v3077_v42  ;;  %v3079_v45 = vpop.eup %2486  ;;  %v3082_v47 = vpop.f32.mrb[18].mxu0  ;;  %2508 = vpow2.f32 %v2098_v29 }
 0x165   :  { %3506 = vst [vmem:[#allocation30_spill] sm:$0xff] %v3082_v47  ;;  %v3084_v48 = vpop.f32.mrb[18].mxu1  ;;  %v3086_v49 = vpop.eup %2488  ;;  %2510 = vpow2.f32 %v2099_v33 }
 0x166   :  { %3507 = vst [vmem:[#allocation31_spill] sm:$0xff] %v3084_v48  ;;  %v3089_v51 = vpop.f32.mrb[19].mxu0  ;;  %v3091_v52 = vpop.f32.mrb[19].mxu1  ;;  %2512 = vpow2.f32 %v2101_v39 }
 0x167   :  { %3508 = vst [vmem:[#allocation32_spill] sm:$0xff] %v3089_v51  ;;  %3509 = vst [vmem:[#allocation33_spill] sm:$0xff] %v3091_v52  ;;  %v3093_v55 = vpop.eup %2490  ;;  %2514 = vpow2.f32 %v2100_v46 }
 0x168   :  { %v3096_v59 = vpop.eup %2492  ;;  %2516 = vpow2.f32 %v2102_v50  ;;  %v3101_v27 = vpop.f32.mrb[20].mxu0 }
 0x169   :  { %v3099_v4 = vpop.eup %2494  ;;  %2518 = vpow2.f32 %v2103_v56  ;;  %3510 = vst [vmem:[#allocation34_spill] sm:$0xff] %v3101_v27  ;;  %v3103_v29 = vpop.f32.mrb[20].mxu1 }
 0x16a   :  { %v2497_v12 = vpop.eup %2496  ;;  %3511 = vst [vmem:[#allocation35_spill] sm:$0xff] %v3103_v29  ;;  %2520 = vpow2.f32 %v2105_v1  ;;  %v3105_v53 = vpop.f32.mrb[21].mxu0 }
 0x16b   :  { %v2499_v20 = vpop.eup %2498  ;;  %v1160_v25 = vadd.f32 1.0, %v2497_v12  ;;  %3512 = vst [vmem:[#allocation36_spill] sm:$0xff] %v3105_v53  ;;  %v3107_v43 = vpop.f32.mrb[21].mxu1 }
 0x16c   :  { %v2501_v33 = vpop.eup %2500  ;;  %v1159_v44 = vadd.f32 1.0, %v2499_v20  ;;  %3513 = vst [vmem:[#allocation37_spill] sm:$0xff] %v3107_v43  ;;  %v3109_v46 = vpop.f32.mrb[22].mxu0 }
 0x16d   :  { %v2503_v39 = vpop.eup %2502  ;;  %2522 = vrcp.f32 %v1160_v25  ;;  %v1161_v54 = vadd.f32 1.0, %v2501_v33  ;;  %3514 = vst [vmem:[#allocation38_spill] sm:$0xff] %v3109_v46  ;;  %v3111_v56 = vpop.f32.mrb[22].mxu1 }
 0x16e   :  { %v2505_v50 = vpop.eup %2504  ;;  %2524 = vrcp.f32 %v1159_v44  ;;  %v1162_v12 = vadd.f32 1.0, %v2503_v39  ;;  %3515 = vst [vmem:[#allocation39_spill] sm:$0xff] %v3111_v56  ;;  %v3113_v36 = vpop.f32.mrb[23].mxu0 }
 0x16f   :  { %v2507_v40 = vpop.eup %2506  ;;  %2526 = vrcp.f32 %v1161_v54  ;;  %v1164_v37 = vadd.f32 1.0, %v2505_v50  ;;  %3516 = vst [vmem:[#allocation40_spill] sm:$0xff] %v3113_v36  ;;  %v3115_v1 = vpop.f32.mrb[23].mxu1 }
 0x170   :  { %3517 = vst [vmem:[#allocation41_spill] sm:$0xff] %v3115_v1  ;;  %v2509_v20 = vpop.eup %2508  ;;  %2528 = vrcp.f32 %v1162_v12  ;;  %v1163_v25 = vadd.f32 1.0, %v2507_v40  ;;  %v3117_v22 = vpop.f32.mrb[24].mxu0 }
 0x171   :  { %v2511_v33 = vpop.eup %2510  ;;  %2530 = vrcp.f32 %v1164_v37  ;;  %v1165_v34 = vadd.f32 1.0, %v2509_v20  ;;  %3518 = vst [vmem:[#allocation42_spill] sm:$0xff] %v3117_v22  ;;  %v3119_v54 = vpop.f32.mrb[24].mxu1 }
 0x172   :  { %v2513_v31 = vpop.eup %2512  ;;  %2532 = vrcp.f32 %v1163_v25  ;;  %v1166_v30 = vadd.f32 1.0, %v2511_v33  ;;  %3519 = vst [vmem:[#allocation43_spill] sm:$0xff] %v3119_v54  ;;  %v3121_v19 = vpop.f32.mrb[25].mxu0 }
 0x173   :  { %v2515_v44 = vpop.eup %2514  ;;  %2534 = vrcp.f32 %v1165_v34  ;;  %v1168_v39 = vadd.f32 1.0, %v2513_v31  ;;  %3520 = vst [vmem:[#allocation44_spill] sm:$0xff] %v3121_v19  ;;  %v3123_v37 = vpop.f32.mrb[25].mxu1  ;;  %v2104_v31 = vmul.f32 -1.442695, %v3035_v60 }
 0x174   :  { %v2517_v50 = vpop.eup %2516  ;;  %2536 = vrcp.f32 %v1166_v30  ;;  %v1167_v21 = vadd.f32 1.0, %v2515_v44  ;;  %v3125_v20 = vpop.f32.mrb[26].mxu0  ;;  %v2106_v44 = vmul.f32 -1.442695, %v3040_v7 }
 0x175   :  { %v2519_v12 = vpop.eup %2518  ;;  %2538 = vrcp.f32 %v1168_v39  ;;  %v1169_v40 = vadd.f32 1.0, %v2517_v50  ;;  %3521 = vst [vmem:[#allocation45_spill] sm:$0xff] %v3125_v20  ;;  %v3128_v33 = vpop.f32.mrb[26].mxu1 }
 0x176   :  { %v2521_v25 = vpop.eup %2520  ;;  %2540 = vrcp.f32 %v1167_v21  ;;  %v1170_v34 = vadd.f32 1.0, %v2519_v12  ;;  %3522 = vst [vmem:[#allocation46_spill] sm:$0xff] %v3128_v33  ;;  %v3133_v19 = vpop.f32.mrb[27].mxu0  ;;  %v2107_v21 = vmul.f32 -1.442695, %v3042_v8  ;;  %v3144_v33 = vmul.f32 %v3037_v63, %v2969_v57 }
 0x177   :  { %v3130_v54 = vpop.eup %2522  ;;  %2542 = vrcp.f32 %v1169_v40  ;;  %v1172_v30 = vadd.f32 1.0, %v2521_v25  ;;  %3523 = vst [vmem:[#allocation47_spill] sm:$0xff] %v3133_v19  ;;  %v3135_v39 = vpop.f32.mrb[27].mxu1  ;;  %v2109_v40 = vmul.f32 -1.442695, %v3047_v13  ;;  %v3151_v19 = vmul.f32 %v3044_v9, %v2971_v58 }
 0x178   :  { %3524 = vst [vmem:[#allocation48_spill] sm:$0xff] %v3135_v39  ;;  %v3137_v50 = vpop.eup %2524  ;;  %2544 = vrcp.f32 %v1170_v34  ;;  %v3155_v34 = vmul.f32 %v3051_v17, %v2975_v61  ;;  %v2108_v39 = vmul.f32 -1.442695, %v3049_v16  ;;  %v3162_v57 = vmul.f32 %v3056_v24, %v2977_v62  ;;  %v3169_v9 = vpop.f32.mrb[28].mxu0 }
 0x179   :  { %v3140_v12 = vpop.eup %2526  ;;  %2546 = vrcp.f32 %v1172_v30  ;;  %v3166_v63 = vmul.f32 %v3059_v26, %v2981_v2  ;;  %v2110_v58 = vmul.f32 -1.442695, %v3054_v23  ;;  %3525 = vst [vmem:[#allocation49_spill] sm:$0xff] %v3169_v9  ;;  %v3171_v61 = vpop.f32.mrb[28].mxu1  ;;  %v3181_v62 = vmul.f32 %v3065_v32, %v2986_v5 }
 0x17a   :  { %v3147_v25 = vpop.eup %2528  ;;  %2548 = vpow2.f32 %v2104_v31  ;;  %3526 = vst [vmem:[#allocation50_spill] sm:$0xff] %v3171_v61  ;;  %v3177_v31 = vmul.f32 %v3062_v28, %v2983_v3  ;;  %v2111_v2 = vmul.f32 -1.442695, %v3068_v0  ;;  %v3184_v24 = vpop.f32.mrb[29].mxu0  ;;  %v2113_v3 = vmul.f32 -1.442695, %v3070_v35 }
 0x17b   :  { %v3158_v20 = vpop.eup %2530  ;;  %2550 = vpow2.f32 %v2106_v44  ;;  %3527 = vst [vmem:[#allocation51_spill] sm:$0xff] %v3184_v24  ;;  %v3186_v26 = vpop.f32.mrb[29].mxu1  ;;  %v3192_v44 = vmul.f32 %v3072_v38, %v2988_v6  ;;  %v2112_v28 = vmul.f32 -1.442695, %v3075_v41  ;;  %v2114_v24 = vmul.f32 -1.442695, %v3077_v42 }
 0x17c   :  { %v3173_v17 = vpop.eup %2532  ;;  %2552 = vpow2.f32 %v2107_v21  ;;  %3528 = vst [vmem:[#allocation52_spill] sm:$0xff] %v3186_v26  ;;  %v3196_v5 = vpop.f32.mrb[30].mxu0  ;;  %v3204_v26 = vmul.f32 %v3079_v45, %v2993_v10  ;;  %v2115_v6 = vmul.f32 -1.442695, %v3082_v47  ;;  %v2116_v10 = vmul.f32 -1.442695, %v3089_v51 }
 0x17d   :  { %v3188_v30 = vpop.eup %2534  ;;  %2554 = vpow2.f32 %v2109_v40  ;;  %3529 = vst [vmem:[#allocation53_spill] sm:$0xff] %v3196_v5  ;;  %v3198_v32 = vpop.f32.mrb[30].mxu1  ;;  %v2117_v5 = vmul.f32 -1.442695, %v3084_v48 }
 0x17e   :  { %3530 = vst [vmem:[#allocation54_spill] sm:$0xff] %v3198_v32  ;;  %v3200_v21 = vpop.eup %2536  ;;  %2556 = vpow2.f32 %v2108_v39  ;;  %v3208_v38 = vpop.f32.mrb[31].mxu0  ;;  %v3216_v32 = vmul.f32 %v3086_v49, %v2995_v11  ;;  %v3224_v39 = vmul.f32 %v3093_v55, %v2999_v14  ;;  %v3236_v49 = vmul.f32 -1.442695, %v3101_v27 }
 0x17f   :  { %3531 = vst [vmem:[#allocation55_spill] sm:$0xff] %v3208_v38  ;;  %v3210_v40 = vpop.f32.mrb[31].mxu1  ;;  %v3212_v61 = vpop.eup %2538  ;;  %2558 = vpow2.f32 %v2110_v58  ;;  %v3231_v38 = vmul.f32 -1.442695, %v3091_v52  ;;  %v3239_v58 = vmul.f32 -1.442695, %v3103_v29  ;;  %v3259_v29 = vmul.f32 %v3099_v4, %v3005_v18 }
 0x180   :  { %3532 = vst [vmem:[#allocation56_spill] sm:$0xff] %v3210_v40  ;;  %v3220_v45 = vpop.eup %2540  ;;  %v3228_v40 = vmul.f32 %v3096_v59, %v3001_v15  ;;  %2560 = vpow2.f32 %v2111_v2  ;;  %v3242_v14 = vmul.f32 -1.442695, %v3105_v53  ;;  %v3247_v15 = vmul.f32 -1.442695, %v3107_v43  ;;  %v762_v43 = vpop.f32.mrb[32].mxu0 }
 0x181   :  { %v3233_v11 = vpop.eup %2542  ;;  %2562 = vpow2.f32 %v2113_v3  ;;  %v3250_v59 = vmul.f32 -1.442695, %v3109_v46  ;;  %v3253_v2 = vmul.f32 -1.442695, %v3111_v56  ;;  %v3262_v53 = vmul.f32 -1.442695, %v3113_v36 }
 0x182   :  { %v3244_v55 = vpop.eup %2544  ;;  %2564 = vpow2.f32 %v2112_v28  ;;  %v3265_v28 = vmul.f32 -1.442695, %v3115_v1  ;;  %v875_v9 = vpop.f32.mrb[32].mxu1  ;;  %v3268_v56 = vmul.f32 -1.442695, %v3117_v22  ;;  %v1402_v27 = vmul.f32 %v3144_v33, %v762_v43 }
 0x183   :  { %v3255_v3 = vpop.eup %2546  ;;  %2566 = vpow2.f32 %v2114_v24  ;;  %v1404_v52 = vmul.f32 %v3151_v19, %v875_v9  ;;  %v764_v18 = vpop.f32.mrb[33].mxu0 }
 0x184   :  { %v2549_v46 = vpop.eup %2548  ;;  %2568 = vpow2.f32 %v2115_v6  ;;  %3533 = vst [vmem:[#allocation57_spill] sm:$0xff] %v3268_v56  ;;  %v877_v4 = vpop.f32.mrb[33].mxu1  ;;  %v1403_v36 = vmul.f32 %v3155_v34, %v764_v18 }
 0x185   :  { %v2551_v24 = vpop.eup %2550  ;;  %v1171_v51 = vadd.f32 1.0, %v2549_v46  ;;  %2570 = vpow2.f32 %v2117_v5  ;;  %v1405_v1 = vmul.f32 %v3162_v57, %v877_v4  ;;  %v766_v48 = vpop.f32.mrb[34].mxu0 }
 0x186   :  { %v879_v47 = vpop.f32.mrb[34].mxu1  ;;  %v2553_v42 = vpop.eup %2552  ;;  %v1173_v6 = vadd.f32 1.0, %v2551_v24  ;;  %2572 = vpow2.f32 %v2116_v10  ;;  %v1406_v22 = vmul.f32 %v3166_v63, %v766_v48 }
 0x187   :  { %v1408_v43 = vmul.f32 %v3177_v31, %v879_v47  ;;  %v768_v33 = vpop.f32.mrb[35].mxu0  ;;  %v881_v19 = vpop.f32.mrb[35].mxu1  ;;  %2574 = vrcp.f32 %v1171_v51  ;;  %v1174_v41 = vadd.f32 1.0, %v2553_v42  ;;  %v3534_v31 = vld [vmem:[#allocation15_spill] sm:$0xff] }
 0x188   :  { %v2555_v9 = vpop.eup %2554  ;;  %v1407_v46 = vmul.f32 %v3181_v62, %v768_v33  ;;  %v1409_v34 = vmul.f32 %v3192_v44, %v881_v19  ;;  %2576 = vrcp.f32 %v1173_v6  ;;  %v1466_v18 = vpack.c.bf16 %v1406_v22, %v1402_v27  ;;  %v3535_v51 = vld [vmem:[#allocation43_spill] sm:$0xff]  ;;  %v3536_v33 = vld [vmem:[#allocation16_spill] sm:$0xff]  ;;  %v3537_v22 = vld [vmem:[#allocation17_spill] sm:$0xff]  ;;  %v885_v27 = vpop.f32.mrb[36].mxu1 }
 0x189   :  { %v2557_v5 = vpop.eup %2556  ;;  %v1176_v57 = vadd.f32 1.0, %v2555_v9  ;;  %v1468_v4 = vpack.c.bf16 %v1408_v43, %v1404_v52  ;;  %2578 = vrcp.f32 %v1174_v41  ;;  %v1352_v56 = vmul.f32 %v3130_v54, %v3534_v31 }
 0x18a   :  { %v2559_v24 = vpop.eup %2558  ;;  %v1175_v10 = vadd.f32 1.0, %v2557_v5  ;;  %v1467_v48 = vpack.c.bf16 %v1407_v46, %v1403_v36  ;;  %v1469_v63 = vpack.c.bf16 %v1409_v34, %v1405_v1  ;;  %v3281_v62 = vmul.f32 -1.442695, %v3535_v51  ;;  %v772_v36 = vpop.f32.mrb[36].mxu0 }
 0x18b   :  { %v2561_v47 = vpop.eup %2560  ;;  %2580 = vrcp.f32 %v1176_v57  ;;  %v1177_v42 = vadd.f32 1.0, %v2559_v24  ;;  %v1351_v6 = vmul.f32 %v3137_v50, %v3536_v33  ;;  %v1353_v52 = vmul.f32 %v3140_v12, %v3537_v22  ;;  %v774_v9 = vpop.f32.mrb[37].mxu0 }
 0x18c   :  { %v2563_v44 = vpop.eup %2562  ;;  %2582 = vrcp.f32 %v1175_v10  ;;  %v1178_v41 = vadd.f32 1.0, %v2561_v47  ;;  %1802 = vmatprep.mubr.bf16.mxu0 %v1467_v48  ;;  %1899 = vmatprep.mubr.bf16.mxu1 %v1469_v63  ;;  %v1410_v43 = vmul.f32 %v3204_v26, %v772_v36  ;;  %v1412_v19 = vmul.f32 %v3216_v32, %v885_v27  ;;  %v887_v46 = vpop.f32.mrb[37].mxu1 }
 0x18d   :  { %v2565_v1 = vpop.eup %2564  ;;  %2584 = vrcp.f32 %v1177_v42  ;;  %v1180_v54 = vadd.f32 1.0, %v2563_v44  ;;  %1803 = vmatmul.mubr.bf16.vlgmr.msra.gmra.mrb[64].mxu0 %v1466_v18  ;;  %1900 = vmatmul.mubr.bf16.vlgmr.msra.gmra.mrb[64].mxu1 %v1468_v4  ;;  %v1411_v34 = vmul.f32 %v3224_v39, %v774_v9  ;;  %v1413_v5 = vmul.f32 %v3228_v40, %v887_v46  ;;  %v776_v57 = vpop.f32.mrb[38].mxu0  ;;  %v3540_v46 = vld [vmem:[#allocation20_spill] sm:$0xff] }
 0x18e   :  { %v2567_v50 = vpop.eup %2566  ;;  %2586 = vrcp.f32 %v1178_v41  ;;  %v1179_v12 = vadd.f32 1.0, %v2565_v1  ;;  %v889_v24 = vpop.f32.mrb[38].mxu1  ;;  %v1414_v26 = vmul.f32 %v3259_v29, %v776_v57  ;;  %v3538_v29 = vld [vmem:[#allocation18_spill] sm:$0xff] }
 0x18f   :  { %v2569_v10 = vpop.eup %2568  ;;  %2588 = vrcp.f32 %v1180_v54  ;;  %v1181_v48 = vadd.f32 1.0, %v2567_v50  ;;  %v1416_v63 = vmul.f32 %v1352_v56, %v889_v24  ;;  %v778_v32 = vpop.f32.mrb[39].mxu0  ;;  %v1354_v56 = vmul.f32 %v3147_v25, %v3538_v29  ;;  %v3539_v54 = vld [vmem:[#allocation19_spill] sm:$0xff]  ;;  %v3541_v50 = vld [vmem:[#allocation21_spill] sm:$0xff]  ;;  %v3544_v24 = vld [vmem:[#allocation24_spill] sm:$0xff] }
 0x190   :  { %v891_v47 = vpop.f32.mrb[39].mxu1  ;;  %v2571_v31 = vpop.eup %2570  ;;  %2590 = vrcp.f32 %v1179_v12  ;;  %v1182_v18 = vadd.f32 1.0, %v2569_v10  ;;  %v1415_v4 = vmul.f32 %v1351_v6, %v778_v32  ;;  %v1470_v33 = vpack.c.bf16 %v1414_v26, %v1410_v43 }
 0x191   :  { %v1417_v42 = vmul.f32 %v1353_v52, %v891_v47  ;;  %v2573_v44 = vpop.eup %2572  ;;  %2592 = vrcp.f32 %v1181_v48  ;;  %v1184_v39 = vadd.f32 1.0, %v2571_v31  ;;  %v1472_v40 = vpack.c.bf16 %v1416_v63, %v1412_v19  ;;  %v3542_v19 = vld [vmem:[#allocation22_spill] sm:$0xff]  ;;  %v782_v57 = vpop.f32.mrb[40].mxu0  ;;  %v3545_v63 = vld [vmem:[#allocation25_spill] sm:$0xff] }
 0x192   :  { %v2575_v22 = vpop.eup %2574  ;;  %2594 = vrcp.f32 %v1182_v18  ;;  %v1183_v41 = vadd.f32 1.0, %v2573_v44  ;;  %v1471_v36 = vpack.c.bf16 %v1415_v4, %v1411_v34  ;;  %v1356_v9 = vmul.f32 %v3158_v20, %v3539_v54  ;;  %v3543_v34 = vld [vmem:[#allocation23_spill] sm:$0xff]  ;;  %v895_v25 = vpop.f32.mrb[40].mxu1 }
 0x193   :  { %v1473_v27 = vpack.c.bf16 %v1417_v42, %v1413_v5  ;;  %v2577_v1 = vpop.eup %2576  ;;  %v1355_v6 = vmul.f32 %v3173_v17, %v3540_v46  ;;  %2596 = vrcp.f32 %v1184_v39  ;;  %v1357_v43 = vmul.f32 %v3188_v30, %v3541_v50  ;;  %v784_v30 = vpop.f32.mrb[41].mxu0 }
 0x194   :  { %v2579_v52 = vpop.eup %2578  ;;  %v1358_v12 = vmul.f32 %v3200_v21, %v3542_v19  ;;  %v1360_v5 = vmul.f32 %v3212_v61, %v3543_v34  ;;  %2598 = vrcp.f32 %v1183_v41  ;;  %1810 = vmatprep.mubr.bf16.mxu0 %v1471_v36  ;;  %v1359_v17 = vmul.f32 %v3220_v45, %v3544_v24  ;;  %v897_v26 = vpop.f32.mrb[41].mxu1  ;;  %v3550_v24 = vld [vmem:[#allocation28_spill] sm:$0xff] }
 0x195   :  { %1907 = vmatprep.mubr.bf16.mxu1 %v1473_v27  ;;  %v2581_v20 = vpop.eup %2580  ;;  %2600 = vpow2.f32 %v3231_v38  ;;  %v1418_v10 = vmul.f32 %v1354_v56, %v782_v57  ;;  %v1420_v48 = vmul.f32 %v1356_v9, %v895_v25  ;;  %1811 = vmatmul.mubr.bf16.gmra.mrb[68].mxu0 %v1470_v33  ;;  %v1361_v61 = vmul.f32 %v3233_v11, %v3545_v63  ;;  %v786_v31 = vpop.f32.mrb[42].mxu0  ;;  %v3546_v38 = vld [vmem:[#allocation44_spill] sm:$0xff]  ;;  %v3547_v27 = vld [vmem:[#allocation26_spill] sm:$0xff]  ;;  %v3548_v9 = vld [vmem:[#allocation27_spill] sm:$0xff] }
 0x196   :  { %1908 = vmatmul.mubr.bf16.gmra.mrb[68].mxu1 %v1472_v40  ;;  %v2583_v21 = vpop.eup %2582  ;;  %2602 = vpow2.f32 %v3236_v49  ;;  %v1419_v32 = vmul.f32 %v1355_v6, %v784_v30  ;;  %v1421_v47 = vmul.f32 %v1357_v43, %v897_v26  ;;  %v899_v18 = vpop.f32.mrb[42].mxu1  ;;  %v2128_v45 = vmul.f32 -1.442695, %v3546_v38 }
 0x197   :  { %v2585_v4 = vpop.eup %2584  ;;  %2604 = vpow2.f32 %v3239_v58  ;;  %v1422_v42 = vmul.f32 %v1358_v12, %v786_v31  ;;  %v1424_v44 = vmul.f32 %v1360_v5, %v899_v18  ;;  %v788_v39 = vpop.f32.mrb[43].mxu0  ;;  %v2130_v11 = vmul.f32 -1.442695, %v3123_v37 }
 0x198   :  { %v901_v33 = vpop.f32.mrb[43].mxu1  ;;  %v2587_v40 = vpop.eup %2586  ;;  %2606 = vpow2.f32 %v3242_v14  ;;  %v1423_v41 = vmul.f32 %v1359_v17, %v788_v39  ;;  %v1362_v29 = vmul.f32 %v3244_v55, %v3547_v27  ;;  %v1364_v46 = vmul.f32 %v3255_v3, %v3548_v9  ;;  %v3554_v27 = vld [vmem:[#allocation32_spill] sm:$0xff] }
 0x199   :  { %v1425_v49 = vmul.f32 %v1361_v61, %v901_v33  ;;  %v2589_v36 = vpop.eup %2588  ;;  %2608 = vpow2.f32 %v3247_v15  ;;  %v1474_v58 = vpack.c.bf16 %v1422_v42, %v1418_v10  ;;  %v1476_v56 = vpack.c.bf16 %v1424_v44, %v1420_v48  ;;  %v905_v5 = vpop.f32.mrb[44].mxu1  ;;  %v3551_v44 = vld [vmem:[#allocation29_spill] sm:$0xff]  ;;  %v3552_v33 = vld [vmem:[#allocation30_spill] sm:$0xff] }
 0x19a   :  { %v2591_v54 = vpop.eup %2590  ;;  %2610 = vpow2.f32 %v3250_v59  ;;  %v1475_v6 = vpack.c.bf16 %v1423_v41, %v1419_v32  ;;  %v1363_v43 = vmul.f32 %v2575_v22, %v3035_v60  ;;  %v1365_v19 = vmul.f32 %v2577_v1, %v3040_v7  ;;  %v792_v59 = vpop.f32.mrb[44].mxu0 }
 0x19b   :  { %v1477_v14 = vpack.c.bf16 %v1425_v49, %v1421_v47  ;;  %v2593_v50 = vpop.eup %2592  ;;  %v1366_v12 = vmul.f32 %v2579_v52, %v3042_v8  ;;  %2612 = vpow2.f32 %v3253_v2  ;;  %v1368_v15 = vmul.f32 %v2581_v20, %v3047_v13  ;;  %v794_v22 = vpop.f32.mrb[45].mxu0  ;;  %v3553_v49 = vld [vmem:[#allocation31_spill] sm:$0xff] }
 0x19c   :  { %v2595_v55 = vpop.eup %2594  ;;  %v1367_v34 = vmul.f32 %v2583_v21, %v3049_v16  ;;  %v1369_v3 = vmul.f32 %v2585_v4, %v3054_v23  ;;  %2614 = vpow2.f32 %v3262_v53  ;;  %1818 = vmatprep.mubr.bf16.mxu0 %v1475_v6  ;;  %v1370_v7 = vmul.f32 %v2587_v40, %v3068_v0  ;;  %v907_v1 = vpop.f32.mrb[45].mxu1  ;;  %v3549_v23 = vld [vmem:[#allocation57_spill] sm:$0xff] }
 0x19d   :  { %1915 = vmatprep.mubr.bf16.mxu1 %v1477_v14  ;;  %v2597_v60 = vpop.eup %2596  ;;  %2616 = vpow2.f32 %v3265_v28  ;;  %v1426_v8 = vmul.f32 %v1362_v29, %v792_v59  ;;  %v1428_v2 = vmul.f32 %v1364_v46, %v905_v5  ;;  %1819 = vmatmul.mubr.bf16.gmra.mrb[72].mxu0 %v1474_v58  ;;  %v1372_v16 = vmul.f32 %v2589_v36, %v3070_v35  ;;  %v796_v57 = vpop.f32.mrb[46].mxu0 }
 0x19e   :  { %1916 = vmatmul.mubr.bf16.gmra.mrb[72].mxu1 %v1476_v56  ;;  %v2599_v13 = vpop.eup %2598  ;;  %2618 = vpow2.f32 %v3549_v23  ;;  %v1427_v53 = vmul.f32 %v1363_v43, %v794_v22  ;;  %v1429_v52 = vmul.f32 %v1365_v19, %v907_v1  ;;  %v909_v25 = vpop.f32.mrb[46].mxu1  ;;  %v1371_v0 = vmul.f32 %v2591_v54, %v3550_v24 }
 0x19f   :  { %v2601_v20 = vpop.eup %2600  ;;  %2620 = vpow2.f32 %v3281_v62  ;;  %v1430_v28 = vmul.f32 %v1366_v12, %v796_v57  ;;  %v1432_v17 = vmul.f32 %v1368_v15, %v909_v25  ;;  %v798_v10 = vpop.f32.mrb[47].mxu0  ;;  %v1373_v39 = vmul.f32 %v2593_v50, %v3551_v44  ;;  %v3560_v44 = vld [vmem:[#allocation34_spill] sm:$0xff] }
 0x1a0   :  { %v911_v48 = vpop.f32.mrb[47].mxu1  ;;  %v2603_v30 = vpop.eup %2602  ;;  %v1185_v26 = vadd.f32 1.0, %v2601_v20  ;;  %2622 = vpow2.f32 %v2128_v45  ;;  %v1431_v21 = vmul.f32 %v1367_v34, %v798_v10  ;;  %v1374_v40 = vmul.f32 %v2595_v55, %v3552_v33  ;;  %v3561_v33 = vld [vmem:[#allocation49_spill] sm:$0xff] }
 0x1a1   :  { %v1433_v35 = vmul.f32 %v1369_v3, %v911_v48  ;;  %v2605_v63 = vpop.eup %2604  ;;  %v1186_v61 = vadd.f32 1.0, %v2603_v30  ;;  %2624 = vpow2.f32 %v2130_v11  ;;  %v1478_v32 = vpack.c.bf16 %v1430_v28, %v1426_v8  ;;  %v802_v58 = vpop.f32.mrb[48].mxu0  ;;  %v3556_v48 = vld [vmem:[#allocation46_spill] sm:$0xff] }
 0x1a2   :  { %v1480_v47 = vpack.c.bf16 %v1432_v17, %v1428_v2  ;;  %v2607_v31 = vpop.eup %2606  ;;  %2626 = vrcp.f32 %v1185_v26  ;;  %v1188_v18 = vadd.f32 1.0, %v2605_v63  ;;  %v1479_v4 = vpack.c.bf16 %v1431_v21, %v1427_v53  ;;  %v915_v56 = vpop.f32.mrb[48].mxu1  ;;  %v3557_v63 = vld [vmem:[#allocation33_spill] sm:$0xff] }
 0x1a3   :  { %v1481_v42 = vpack.c.bf16 %v1433_v35, %v1429_v52  ;;  %v2609_v62 = vpop.eup %2608  ;;  %2628 = vrcp.f32 %v1186_v61  ;;  %v1187_v41 = vadd.f32 1.0, %v2607_v31  ;;  %v1376_v36 = vmul.f32 %v2597_v60, %v3553_v49  ;;  %v804_v14 = vpop.f32.mrb[49].mxu0  ;;  %v3559_v31 = vld [vmem:[#allocation48_spill] sm:$0xff] }
 0x1a4   :  { %v2611_v45 = vpop.eup %2610  ;;  %v1375_v29 = vmul.f32 %v2599_v13, %v3554_v27  ;;  %2630 = vrcp.f32 %v1188_v18  ;;  %v1189_v11 = vadd.f32 1.0, %v2609_v62  ;;  %1826 = vmatprep.mubr.bf16.mxu0 %v1479_v4  ;;  %v1434_v46 = vmul.f32 %v1370_v7, %v802_v58  ;;  %v917_v50 = vpop.f32.mrb[49].mxu1  ;;  %v3564_v58 = vld [vmem:[#allocation51_spill] sm:$0xff] }
 0x1a5   :  { %1923 = vmatprep.mubr.bf16.mxu1 %v1481_v42  ;;  %v2613_v54 = vpop.eup %2612  ;;  %2632 = vrcp.f32 %v1187_v41  ;;  %v1190_v9 = vadd.f32 1.0, %v2611_v45  ;;  %v3338_v6 = vmul.f32 %v1372_v16, %v915_v56  ;;  %1827 = vmatmul.mubr.bf16.gmra.mrb[76].mxu0 %v1478_v32  ;;  %v1435_v12 = vmul.f32 %v1371_v0, %v804_v14  ;;  %v806_v15 = vpop.f32.mrb[50].mxu0  ;;  %v3555_v0 = vld [vmem:[#allocation45_spill] sm:$0xff]  ;;  %v3558_v32 = vld [vmem:[#allocation47_spill] sm:$0xff]  ;;  %v3562_v41 = vld [vmem:[#allocation50_spill] sm:$0xff] }
 0x1a6   :  { %1924 = vmatmul.mubr.bf16.gmra.mrb[76].mxu1 %v1480_v47  ;;  %v2615_v43 = vpop.eup %2614  ;;  %2634 = vrcp.f32 %v1189_v11  ;;  %v1192_v19 = vadd.f32 1.0, %v2613_v54  ;;  %v3340_v55 = vmul.f32 %v1373_v39, %v917_v50  ;;  %v919_v34 = vpop.f32.mrb[50].mxu1  ;;  %v1438_v5 = vmul.f32 %v1374_v40, %v806_v15  ;;  %v3565_v14 = vld [vmem:[#allocation36_spill] sm:$0xff] }
 0x1a7   :  { %v2617_v3 = vpop.eup %2616  ;;  %2636 = vrcp.f32 %v1190_v9  ;;  %v1191_v59 = vadd.f32 1.0, %v2615_v43  ;;  %v3342_v60 = vmul.f32 %v1376_v36, %v919_v34  ;;  %v808_v7 = vpop.f32.mrb[51].mxu0  ;;  %v2131_v28 = vmul.f32 -1.442695, %v3555_v0  ;;  %v3566_v43 = vld [vmem:[#allocation52_spill] sm:$0xff]  ;;  %v3567_v34 = vld [vmem:[#allocation37_spill] sm:$0xff] }
 0x1a8   :  { %v921_v8 = vpop.f32.mrb[51].mxu1  ;;  %v2619_v2 = vpop.eup %2618  ;;  %2638 = vrcp.f32 %v1192_v19  ;;  %v1193_v22 = vadd.f32 1.0, %v2617_v3  ;;  %v1439_v1 = vmul.f32 %v1375_v29, %v808_v7  ;;  %v1482_v23 = vpack.c.bf16 %v1438_v5, %v1434_v46  ;;  %v3563_v29 = vld [vmem:[#allocation35_spill] sm:$0xff]  ;;  %v3568_v7 = vld [vmem:[#allocation38_spill] sm:$0xff] }
 0x1a9   :  { %v2621_v13 = vpop.eup %2620  ;;  %2640 = vrcp.f32 %v1191_v59  ;;  %v1194_v16 = vadd.f32 1.0, %v2619_v2  ;;  %v1484_v53 = vpack.c.bf16 %v3342_v60, %v3338_v6  ;;  %v2133_v30 = vmul.f32 -1.442695, %v3556_v48  ;;  %v812_v26 = vpop.f32.mrb[52].mxu0  ;;  %v3569_v2 = vld [vmem:[#allocation53_spill] sm:$0xff] }
 0x1aa   :  { %v2623_v52 = vpop.eup %2622  ;;  %2642 = vrcp.f32 %v1193_v22  ;;  %v1196_v57 = vadd.f32 1.0, %v2621_v13  ;;  %v1483_v25 = vpack.c.bf16 %v1439_v1, %v1435_v12  ;;  %v925_v21 = vpop.f32.mrb[52].mxu1  ;;  %v2132_v47 = vmul.f32 -1.442695, %v3558_v32 }
 0x1ab   :  { %v2625_v20 = vpop.eup %2624  ;;  %2644 = vrcp.f32 %v1194_v16  ;;  %v1195_v24 = vadd.f32 1.0, %v2623_v52  ;;  %v2134_v18 = vmul.f32 -1.442695, %v3559_v31  ;;  %v814_v4 = vpop.f32.mrb[53].mxu0  ;;  %v2135_v40 = vmul.f32 -1.442695, %v3561_v33 }
 0x1ac   :  { %v2627_v17 = vpop.eup %2626  ;;  %2646 = vrcp.f32 %v1196_v57  ;;  %v1197_v10 = vadd.f32 1.0, %v2625_v20  ;;  %1834 = vmatprep.mubr.bf16.mxu0 %v1483_v25  ;;  %v927_v42 = vpop.f32.mrb[53].mxu1  ;;  %v2137_v45 = vmul.f32 -1.442695, %v3562_v41  ;;  %v2136_v56 = vmul.f32 -1.442695, %v3564_v58 }
 0x1ad   :  { %v2629_v35 = vpop.eup %2628  ;;  %v1377_v61 = vmul.f32 %v2627_v17, %v3557_v63  ;;  %2648 = vrcp.f32 %v1195_v24  ;;  %1835 = vmatmul.mubr.bf16.gmra.mrb[80].mxu0 %v1482_v23  ;;  %v816_v49 = vpop.f32.mrb[54].mxu0  ;;  %v2138_v19 = vmul.f32 -1.442695, %v3566_v43  ;;  %v2139_v22 = vmul.f32 -1.442695, %v3569_v2  ;;  %v3570_v16 = vld [vmem:[#allocation39_spill] sm:$0xff] }
 0x1ae   :  { %v2631_v62 = vpop.eup %2630  ;;  %v1378_v39 = vmul.f32 %v2629_v35, %v3560_v44  ;;  %2650 = vrcp.f32 %v1197_v10  ;;  %v929_v36 = vpop.f32.mrb[54].mxu1  ;;  %v3571_v52 = vld [vmem:[#allocation54_spill] sm:$0xff]  ;;  %v3572_v24 = vld [vmem:[#allocation40_spill] sm:$0xff]  ;;  %v3574_v35 = vld [vmem:[#allocation41_spill] sm:$0xff] }
 0x1af   :  { %v2633_v27 = vpop.eup %2632  ;;  %v1380_v11 = vmul.f32 %v2631_v62, %v3563_v29  ;;  %2652 = vpow2.f32 %v2131_v28  ;;  %v1441_v54 = vmul.f32 %v1377_v61, %v921_v8  ;;  %v818_v9 = vpop.f32.mrb[55].mxu0  ;;  %v2141_v57 = vmul.f32 -1.442695, %v3571_v52  ;;  %v3573_v28 = vld [vmem:[#allocation55_spill] sm:$0xff]  ;;  %v3575_v61 = vld [vmem:[#allocation56_spill] sm:$0xff]  ;;  %v3576_v44 = vld [vmem:[#allocation42_spill] sm:$0xff] }
 0x1b0   :  { %v931_v46 = vpop.f32.mrb[55].mxu1  ;;  %v2635_v6 = vpop.eup %2634  ;;  %v1379_v50 = vmul.f32 %v2633_v27, %v3565_v14  ;;  %2654 = vpow2.f32 %v2133_v30  ;;  %v3358_v12 = vmul.f32 %v1378_v39, %v812_v26  ;;  %v2140_v17 = vmul.f32 -1.442695, %v3573_v28 }
 0x1b1   :  { %v2637_v15 = vpop.eup %2636  ;;  %v1381_v3 = vmul.f32 %v2635_v6, %v3567_v34  ;;  %2656 = vpow2.f32 %v2132_v47  ;;  %v1485_v59 = vpack.c.bf16 %v1441_v54, %v3340_v55  ;;  %v3362_v5 = vmul.f32 %v1380_v11, %v925_v21  ;;  %v822_v30 = vpop.f32.mrb[56].mxu0 }
 0x1b2   :  { %v2639_v60 = vpop.eup %2638  ;;  %v1382_v8 = vmul.f32 %v2637_v15, %v3568_v7  ;;  %2658 = vpow2.f32 %v2134_v18  ;;  %v1443_v1 = vmul.f32 %v1379_v50, %v814_v4  ;;  %v935_v26 = vpop.f32.mrb[56].mxu1  ;;  %v2142_v47 = vmul.f32 -1.442695, %v3575_v61 }
 0x1b3   :  { %v2641_v13 = vpop.eup %2640  ;;  %v1384_v23 = vmul.f32 %v2639_v60, %v3570_v16  ;;  %2660 = vpow2.f32 %v2135_v40  ;;  %1931 = vmatprep.mubr.bf16.mxu1 %v1485_v59  ;;  %v1445_v25 = vmul.f32 %v1381_v3, %v927_v42  ;;  %v824_v4 = vpop.f32.mrb[57].mxu0 }
 0x1b4   :  { %v2643_v20 = vpop.eup %2642  ;;  %v1383_v55 = vmul.f32 %v2641_v13, %v3572_v24  ;;  %2662 = vpow2.f32 %v2137_v45  ;;  %1932 = vmatmul.mubr.bf16.gmra.mrb[80].mxu1 %v1484_v53  ;;  %v1446_v10 = vmul.f32 %v1382_v8, %v816_v49  ;;  %v937_v62 = vpop.f32.mrb[57].mxu1 }
 0x1b5   :  { %v2645_v21 = vpop.eup %2644  ;;  %v1385_v63 = vmul.f32 %v2643_v20, %v3574_v35  ;;  %2664 = vpow2.f32 %v2136_v56  ;;  %v1448_v18 = vmul.f32 %v1384_v23, %v929_v36  ;;  %v3374_v53 = vpop.f32.mrb[58].mxu0 }
 0x1b6   :  { %v2647_v42 = vpop.eup %2646  ;;  %v1386_v39 = vmul.f32 %v2645_v21, %v3576_v44  ;;  %2666 = vpow2.f32 %v2138_v19  ;;  %v1486_v40 = vpack.c.bf16 %v1446_v10, %v3358_v12  ;;  %v1447_v45 = vmul.f32 %v1383_v55, %v818_v9  ;;  %v3376_v49 = vpop.f32.mrb[58].mxu1 }
 0x1b7   :  { %v2649_v27 = vpop.eup %2648  ;;  %v1388_v29 = vmul.f32 %v2647_v42, %v3535_v51  ;;  %2668 = vpow2.f32 %v2139_v22  ;;  %v1488_v11 = vpack.c.bf16 %v1448_v18, %v3362_v5  ;;  %v1449_v36 = vmul.f32 %v1385_v63, %v931_v46  ;;  %v3380_v56 = vpop.f32.mrb[59].mxu0 }
 0x1b8   :  { %v3382_v54 = vpop.f32.mrb[59].mxu1  ;;  %v2651_v6 = vpop.eup %2650  ;;  %v1387_v14 = vmul.f32 %v2649_v27, %v3546_v38  ;;  %2670 = vpow2.f32 %v2141_v57  ;;  %v1487_v9 = vpack.c.bf16 %v1447_v45, %v1443_v1  ;;  %v3385_v50 = vmul.f32 %v1386_v39, %v822_v30 }
 0x1b9   :  { %v2653_v19 = vpop.eup %2652  ;;  %v1389_v12 = vmul.f32 %v2651_v6, %v3123_v37  ;;  %2672 = vpow2.f32 %v2140_v17  ;;  %v1489_v51 = vpack.c.bf16 %v1449_v36, %v1445_v25  ;;  %v3388_v15 = vmul.f32 %v1388_v29, %v935_v26  ;;  %v832_v37 = vpop.f32.mrb[60].mxu0 }
 0x1ba   :  { %v2655_v34 = vpop.eup %2654  ;;  %v1198_v46 = vadd.f32 1.0, %v2653_v19  ;;  %2674 = vpow2.f32 %v2142_v47  ;;  %1842 = vmatprep.mubr.bf16.mxu0 %v1487_v9  ;;  %v3390_v3 = vmul.f32 %v1387_v14, %v824_v4  ;;  %v945_v8 = vpop.f32.mrb[60].mxu1 }
 0x1bb   :  { %v2657_v59 = vpop.eup %2656  ;;  %v1200_v5 = vadd.f32 1.0, %v2655_v34  ;;  %1939 = vmatprep.mubr.bf16.mxu1 %v1489_v51  ;;  %v3392_v38 = vmul.f32 %v1389_v12, %v937_v62  ;;  %1843 = vmatmul.mubr.bf16.gmra.mrb[84].mxu0 %v1486_v40  ;;  %v834_v13 = vpop.f32.mrb[61].mxu0 }
 0x1bc   :  { %v2659_v60 = vpop.eup %2658  ;;  %2676 = vrcp.f32 %v1198_v46  ;;  %v1199_v7 = vadd.f32 1.0, %v2657_v59  ;;  %1940 = vmatmul.mubr.bf16.gmra.mrb[84].mxu1 %v1488_v11  ;;  %v3394_v16 = vpop.f32.mrb[61].mxu1 }
 0x1bd   :  { %v2661_v22 = vpop.eup %2660  ;;  %2678 = vrcp.f32 %v1200_v5  ;;  %v1201_v1 = vadd.f32 1.0, %v2659_v60  ;;  %v3396_v25 = vpop.f32.mrb[62].mxu0 }
 0x1be   :  { %v2663_v23 = vpop.eup %2662  ;;  %2680 = vrcp.f32 %v1199_v7  ;;  %v1202_v57 = vadd.f32 1.0, %v2661_v22  ;;  %v3398_v20 = vpop.f32.mrb[62].mxu1 }
 0x1bf   :  { %v2665_v24 = vpop.eup %2664  ;;  %2682 = vrcp.f32 %v1201_v1  ;;  %v1204_v55 = vadd.f32 1.0, %v2663_v23  ;;  %v3400_v17 = vpop.f32.mrb[63].mxu0 }
 0x1c0   :  { %v3402_v10 = vpop.f32.mrb[63].mxu1  ;;  %v2667_v30 = vpop.eup %2666  ;;  %2684 = vrcp.f32 %v1202_v57  ;;  %v1203_v26 = vadd.f32 1.0, %v2665_v24 }
 0x1c1   :  { %v2669_v21 = vpop.eup %2668  ;;  %2686 = vrcp.f32 %v1204_v55  ;;  %v1205_v35 = vadd.f32 1.0, %v2667_v30 }
 0x1c2   :  { %v2671_v63 = vpop.eup %2670  ;;  %2688 = vrcp.f32 %v1203_v26  ;;  %v1206_v47 = vadd.f32 1.0, %v2669_v21 }
 0x1c3   :  { %v2673_v18 = vpop.eup %2672  ;;  %2690 = vrcp.f32 %v1205_v35  ;;  %v1208_v4 = vadd.f32 1.0, %v2671_v63 }
 0x1c4   :  { %v2675_v62 = vpop.eup %2674  ;;  %2692 = vrcp.f32 %v1206_v47  ;;  %v1207_v42 = vadd.f32 1.0, %v2673_v18 }
 0x1c5   :  { %2694 = vrcp.f32 %v1208_v4  ;;  %v1209_v44 = vadd.f32 1.0, %v2675_v62 }
 0x1c6   :  { %v2677_v39 = vpop.eup %2676  ;;  %2696 = vrcp.f32 %v1207_v42 }
 0x1c7   :  { %v2679_v40 = vpop.eup %2678  ;;  %v1390_v45 = vmul.f32 %v2677_v39, %v3555_v0  ;;  %2698 = vrcp.f32 %v1209_v44 }
 0x1c8   :  { %v2681_v27 = vpop.eup %2680  ;;  %v1392_v29 = vmul.f32 %v2679_v40, %v3556_v48 }
 0x1c9   :  { %v2683_v11 = vpop.eup %2682  ;;  %v1391_v36 = vmul.f32 %v2681_v27, %v3558_v32  ;;  %v1454_v6 = vmul.f32 %v1390_v45, %v3374_v53 }
 0x1ca   :  { %v2685_v14 = vpop.eup %2684  ;;  %v1393_v9 = vmul.f32 %v2683_v11, %v3559_v31  ;;  %v1456_v19 = vmul.f32 %v1392_v29, %v3376_v49 }
 0x1cb   :  { %v2687_v12 = vpop.eup %2686  ;;  %v1394_v51 = vmul.f32 %v2685_v14, %v3561_v33  ;;  %v1490_v34 = vpack.c.bf16 %v1454_v6, %v3385_v50  ;;  %v1455_v0 = vmul.f32 %v1391_v36, %v3380_v56 }
 0x1cc   :  { %v2689_v46 = vpop.eup %2688  ;;  %v1396_v48 = vmul.f32 %v2687_v12, %v3562_v41  ;;  %v1492_v59 = vpack.c.bf16 %v1456_v19, %v3388_v15  ;;  %v1457_v32 = vmul.f32 %v1393_v9, %v3382_v54 }
 0x1cd   :  { %v2691_v53 = vpop.eup %2690  ;;  %v1395_v5 = vmul.f32 %v2689_v46, %v3564_v58  ;;  %v1491_v31 = vpack.c.bf16 %v1455_v0, %v3390_v3  ;;  %v1458_v49 = vmul.f32 %v1394_v51, %v832_v37 }
 0x1ce   :  { %v2693_v60 = vpop.eup %2692  ;;  %v1397_v33 = vmul.f32 %v2691_v53, %v3566_v43  ;;  %v1493_v50 = vpack.c.bf16 %v1457_v32, %v3392_v38  ;;  %v1460_v7 = vmul.f32 %v1396_v48, %v945_v8 }
 0x1cf   :  { %v2695_v56 = vpop.eup %2694  ;;  %v1398_v22 = vmul.f32 %v2693_v60, %v3569_v2  ;;  %1850 = vmatprep.mubr.bf16.mxu0 %v1491_v31  ;;  %v1459_v41 = vmul.f32 %v1395_v5, %v834_v13 }
 0x1d0   :  { %v2697_v15 = vpop.eup %2696  ;;  %v1400_v54 = vmul.f32 %v2695_v56, %v3571_v52  ;;  %1947 = vmatprep.mubr.bf16.mxu1 %v1493_v50  ;;  %v1461_v58 = vmul.f32 %v1397_v33, %v3394_v16  ;;  %1851 = vmatmul.mubr.bf16.gmra.mrb[88].mxu0 %v1490_v34 }
 0x1d1   :  { %v2699_v3 = vpop.eup %2698  ;;  %v1399_v37 = vmul.f32 %v2697_v15, %v3573_v28  ;;  %1948 = vmatmul.mubr.bf16.gmra.mrb[88].mxu1 %v1492_v59  ;;  %v1462_v43 = vmul.f32 %v1398_v22, %v3396_v25 }
 0x1d2   :  { %v1401_v38 = vmul.f32 %v2699_v3, %v3575_v61  ;;  %v1464_v8 = vmul.f32 %v1400_v54, %v3398_v20 }
 0x1d3   :  { %v1494_v2 = vpack.c.bf16 %v1462_v43, %v1458_v49  ;;  %v1463_v1 = vmul.f32 %v1399_v37, %v3400_v17 }
 0x1d4   :  { %v1496_v13 = vpack.c.bf16 %v1464_v8, %v1460_v7  ;;  %v1465_v52 = vmul.f32 %v1401_v38, %v3402_v10 }
 0x1d5   :  { %v1495_v23 = vpack.c.bf16 %v1463_v1, %v1459_v41 }
 0x1d6   :  { %v1497_v57 = vpack.c.bf16 %v1465_v52, %v1461_v58 }
 0x1d7   :  { %1858 = vmatprep.mubr.bf16.mxu0 %v1495_v23 }
 0x1d8   :  { %1955 = vmatprep.mubr.bf16.mxu1 %v1497_v57  ;;  %1859 = vmatmul.mubr.bf16.gmra.mrb[92].mxu0 %v1494_v2 }
 0x1d9   :  { %1956 = vmatmul.mubr.bf16.gmra.mrb[92].mxu1 %v1496_v13 }
 0x260   :  { %v2191_v28 = vpop.f32.mrb[64].mxu0  ;;  %v2255_v16 = vpop.f32.mrb[64].mxu1 }
 0x261   :  { %v2192_v24 = vpop.f32.mrb[65].mxu0  ;;  %v2256_v25 = vpop.f32.mrb[65].mxu1 }
 0x262   :  { %v2193_v55 = vadd.f32 %v2192_v24, %v2191_v28  ;;  %v2257_v61 = vadd.f32 %v2256_v25, %v2255_v16  ;;  %v2194_v30 = vpop.f32.mrb[66].mxu0  ;;  %v2258_v20 = vpop.f32.mrb[66].mxu1 }
 0x263   :  { %v2195_v26 = vpop.f32.mrb[67].mxu0  ;;  %v2259_v21 = vpop.f32.mrb[67].mxu1 }
 0x264   :  { %v1902_v17 = vadd.f32 %v2257_v61, %v2193_v55  ;;  %v2196_v35 = vadd.f32 %v2195_v26, %v2194_v30  ;;  %v2260_v63 = vadd.f32 %v2259_v21, %v2258_v20 }
 0x266   :  { %v1905_v10 = vadd.f32 %v2260_v63, %v2196_v35  ;;  %1980 = vst [vmem:[#allocation10] sm:$0xff] %v1902_v17 }
 0x268   :  { %v2197_v47 = vpop.f32.mrb[68].mxu0  ;;  %1981 = vst [vmem:[#allocation10 + $0x8] sm:$0xff] %v1905_v10 }
 0x269   :  { %v2261_v18 = vpop.f32.mrb[68].mxu1  ;;  %v2198_v4 = vpop.f32.mrb[69].mxu0 }
 0x26a   :  { %v2262_v62 = vpop.f32.mrb[69].mxu1  ;;  %v2199_v42 = vadd.f32 %v2198_v4, %v2197_v47  ;;  %v2200_v39 = vpop.f32.mrb[70].mxu0 }
 0x26b   :  { %v2263_v44 = vadd.f32 %v2262_v62, %v2261_v18  ;;  %v2264_v40 = vpop.f32.mrb[70].mxu1  ;;  %v2201_v45 = vpop.f32.mrb[71].mxu0 }
 0x26c   :  { %v2265_v27 = vpop.f32.mrb[71].mxu1  ;;  %v2202_v11 = vadd.f32 %v2201_v45, %v2200_v39 }
 0x26d   :  { %v1910_v29 = vadd.f32 %v2263_v44, %v2199_v42  ;;  %v2266_v36 = vadd.f32 %v2265_v27, %v2264_v40 }
 0x26f   :  { %v1913_v6 = vadd.f32 %v2266_v36, %v2202_v11  ;;  %1982 = vst [vmem:[#allocation10 + $0x10] sm:$0xff] %v1910_v29 }
 0x270   :  { %v2203_v14 = vpop.f32.mrb[72].mxu0 }
 0x271   :  { %v2267_v9 = vpop.f32.mrb[72].mxu1  ;;  %v2204_v19 = vpop.f32.mrb[73].mxu0  ;;  %1983 = vst [vmem:[#allocation10 + $0x18] sm:$0xff] %v1913_v6 }
 0x272   :  { %v2268_v12 = vpop.f32.mrb[73].mxu1  ;;  %v2205_v51 = vadd.f32 %v2204_v19, %v2203_v14  ;;  %v2206_v0 = vpop.f32.mrb[74].mxu0 }
 0x273   :  { %v2269_v34 = vadd.f32 %v2268_v12, %v2267_v9  ;;  %v2270_v46 = vpop.f32.mrb[74].mxu1  ;;  %v2207_v48 = vpop.f32.mrb[75].mxu0 }
 0x274   :  { %v2271_v59 = vpop.f32.mrb[75].mxu1  ;;  %v2208_v53 = vadd.f32 %v2207_v48, %v2206_v0 }
 0x275   :  { %v1918_v32 = vadd.f32 %v2269_v34, %v2205_v51  ;;  %v2272_v5 = vadd.f32 %v2271_v59, %v2270_v46 }
 0x277   :  { %v1921_v31 = vadd.f32 %v2272_v5, %v2208_v53  ;;  %1984 = vst [vmem:[#allocation10 + $0x20] sm:$0xff] %v1918_v32 }
 0x278   :  { %v2209_v49 = vpop.f32.mrb[76].mxu0 }
 0x279   :  { %v2273_v60 = vpop.f32.mrb[76].mxu1  ;;  %v2210_v33 = vpop.f32.mrb[77].mxu0  ;;  %1985 = vst [vmem:[#allocation10 + $0x28] sm:$0xff] %v1921_v31 }
 0x27a   :  { %v2274_v50 = vpop.f32.mrb[77].mxu1  ;;  %v2211_v7 = vadd.f32 %v2210_v33, %v2209_v49  ;;  %v2212_v22 = vpop.f32.mrb[78].mxu0 }
 0x27b   :  { %v2275_v56 = vadd.f32 %v2274_v50, %v2273_v60  ;;  %v2276_v41 = vpop.f32.mrb[78].mxu1  ;;  %v2213_v15 = vpop.f32.mrb[79].mxu0 }
 0x27c   :  { %v2277_v54 = vpop.f32.mrb[79].mxu1  ;;  %v2214_v3 = vadd.f32 %v2213_v15, %v2212_v22 }
 0x27d   :  { %v1926_v58 = vadd.f32 %v2275_v56, %v2211_v7  ;;  %v2278_v37 = vadd.f32 %v2277_v54, %v2276_v41 }
 0x27f   :  { %v1929_v43 = vadd.f32 %v2278_v37, %v2214_v3  ;;  %1986 = vst [vmem:[#allocation10 + $0x30] sm:$0xff] %v1926_v58 }
 0x280   :  { %v2215_v38 = vpop.f32.mrb[80].mxu0 }
 0x281   :  { %v2216_v8 = vpop.f32.mrb[81].mxu0  ;;  %1987 = vst [vmem:[#allocation10 + $0x38] sm:$0xff] %v1929_v43 }
 0x282   :  { %v2217_v2 = vadd.f32 %v2216_v8, %v2215_v38  ;;  %v2218_v1 = vpop.f32.mrb[82].mxu0 }
 0x283   :  { %v2219_v13 = vpop.f32.mrb[83].mxu0 }
 0x284   :  { %v2220_v52 = vadd.f32 %v2219_v13, %v2218_v1 }
 0x287   :  { %v2279_v23 = vpop.f32.mrb[80].mxu1 }
 0x288   :  { %v2280_v57 = vpop.f32.mrb[81].mxu1 }
 0x289   :  { %v2281_v28 = vadd.f32 %v2280_v57, %v2279_v23  ;;  %v2282_v16 = vpop.f32.mrb[82].mxu1 }
 0x28a   :  { %v2283_v24 = vpop.f32.mrb[83].mxu1 }
 0x28b   :  { %v1934_v25 = vadd.f32 %v2281_v28, %v2217_v2  ;;  %v2284_v55 = vadd.f32 %v2283_v24, %v2282_v16 }
 0x28d   :  { %v1937_v61 = vadd.f32 %v2284_v55, %v2220_v52  ;;  %1988 = vst [vmem:[#allocation10 + $0x40] sm:$0xff] %v1934_v25 }
 0x28e   :  { %v2221_v30 = vpop.f32.mrb[84].mxu0 }
 0x28f   :  { %v2285_v20 = vpop.f32.mrb[84].mxu1  ;;  %v2222_v26 = vpop.f32.mrb[85].mxu0  ;;  %1989 = vst [vmem:[#allocation10 + $0x48] sm:$0xff] %v1937_v61 }
 0x290   :  { %v2223_v21 = vadd.f32 %v2222_v26, %v2221_v30  ;;  %v2286_v17 = vpop.f32.mrb[85].mxu1  ;;  %v2224_v35 = vpop.f32.mrb[86].mxu0 }
 0x291   :  { %v2287_v63 = vadd.f32 %v2286_v17, %v2285_v20  ;;  %v2288_v10 = vpop.f32.mrb[86].mxu1  ;;  %v2225_v47 = vpop.f32.mrb[87].mxu0 }
 0x292   :  { %v2226_v18 = vadd.f32 %v2225_v47, %v2224_v35  ;;  %v2289_v4 = vpop.f32.mrb[87].mxu1 }
 0x293   :  { %v1942_v62 = vadd.f32 %v2287_v63, %v2223_v21  ;;  %v2290_v42 = vadd.f32 %v2289_v4, %v2288_v10 }
 0x295   :  { %v1945_v44 = vadd.f32 %v2290_v42, %v2226_v18  ;;  %1990 = vst [vmem:[#allocation10 + $0x50] sm:$0xff] %v1942_v62 }
 0x297   :  { %1991 = vst [vmem:[#allocation10 + $0x58] sm:$0xff] %v1945_v44 }
 0x2a3   :  { %v2227_v39 = vpop.f32.mrb[88].mxu0 }
 0x2a4   :  { %v2291_v40 = vpop.f32.mrb[88].mxu1  ;;  %v2228_v45 = vpop.f32.mrb[89].mxu0 }
 0x2a5   :  { %v2229_v27 = vadd.f32 %v2228_v45, %v2227_v39  ;;  %v2292_v29 = vpop.f32.mrb[89].mxu1  ;;  %v2230_v11 = vpop.f32.mrb[90].mxu0 }
 0x2a6   :  { %v2293_v36 = vadd.f32 %v2292_v29, %v2291_v40  ;;  %v2294_v6 = vpop.f32.mrb[90].mxu1  ;;  %v2231_v14 = vpop.f32.mrb[91].mxu0 }
 0x2a7   :  { %v2232_v9 = vadd.f32 %v2231_v14, %v2230_v11  ;;  %v2295_v19 = vpop.f32.mrb[91].mxu1 }
 0x2a8   :  { %v1950_v12 = vadd.f32 %v2293_v36, %v2229_v27  ;;  %v2296_v51 = vadd.f32 %v2295_v19, %v2294_v6 }
 0x2aa   :  { %v1953_v34 = vadd.f32 %v2296_v51, %v2232_v9  ;;  %1992 = vst [vmem:[#allocation10 + $0x60] sm:$0xff] %v1950_v12 }
 0x2ab   :  { %v2233_v0 = vpop.f32.mrb[92].mxu0 }
 0x2ac   :  { %v2297_v46 = vpop.f32.mrb[92].mxu1  ;;  %v2234_v48 = vpop.f32.mrb[93].mxu0  ;;  %1993 = vst [vmem:[#allocation10 + $0x68] sm:$0xff] %v1953_v34 }
 0x2ad   :  { %v2235_v59 = vadd.f32 %v2234_v48, %v2233_v0  ;;  %v2298_v32 = vpop.f32.mrb[93].mxu1  ;;  %v2236_v53 = vpop.f32.mrb[94].mxu0 }
 0x2ae   :  { %v2299_v5 = vadd.f32 %v2298_v32, %v2297_v46  ;;  %v2300_v31 = vpop.f32.mrb[94].mxu1  ;;  %v2237_v49 = vpop.f32.mrb[95].mxu0 }
 0x2af   :  { %v2238_v60 = vadd.f32 %v2237_v49, %v2236_v53  ;;  %v2301_v33 = vpop.f32.mrb[95].mxu1 }
 0x2b0   :  { %v1958_v50 = vadd.f32 %v2299_v5, %v2235_v59  ;;  %v2302_v7 = vadd.f32 %v2301_v33, %v2300_v31 }
 0x2b2   :  { %v1961_v56 = vadd.f32 %v2302_v7, %v2238_v60  ;;  %1994 = vst [vmem:[#allocation10 + $0x70] sm:$0xff] %v1958_v50 }
 0x2b4   :  { %1995 = vst [vmem:[#allocation10 + $0x78] sm:$0xff] %v1961_v56 }
 0x2b5   :  { %2799 = shalt.err (!%p2796_p8)
}
 0x2b6   :  { %s2800_s19 = scalar_lea.hbm %s3448_s4, 2048 }
 0x2b7   :  { %p2801_p9 = scmp.ne.s32.totalorder %s3448_s4, %s2800_s19  ;;  %p2804_p10 = scmp.lt.u32.totalorder %s2800_s19, %s3448_s4 }
 0x2b9   :  { %p2806_p11 = pnand %p2804_p10, %p2801_p9 }
 0x2bb   :  { %2809 = shalt.err (!%p2806_p11)
}
 0x2bc   :  { %2007 = dma.vmem_to_hbm [thread:$0]  %s2002_s15, 2048, %s3448_s4, [#allocation4], %s2822_s1, %s2822_s1, %s2823_s13  }
 0x2bd   :  { %2816 = dma.done.wait [#allocation4], 2048  }
 0x2be   :  { %2817 = vsyncadd [#allocation4], 4294965248 }
 0x2bf   :  { %2011 = vsyncpa [#allocation3], 1 }
 0x2c0   :  { %2012 = vsyncpa [#allocation6], 1 }
 0x2c1   :  { %2013 = vsyncpa [#allocation9], 1 }
 0x2c2   :  { %2014 = vsyncpa [#allocation4], 1 }

</bundles_post_ra>
